<compile_context>
chip_gen: v7x
topology: tpu7x:2x2x1
jax: 0.10.0
libtpu: 0.0.40
codegen_flags: <defaults>
</compile_context>

<pallas_src>
import jax
import jax.numpy as jnp
from jax.experimental import pallas as pl
from jax.experimental.pallas import tpu as pltpu

F_IN = 1000          # backbone output features
F_PAD = 1024         # layer-1 contraction dim padded to a multiple of 128
LANE = 128
SUBLANE = 8
TB_MAX = 512         # max batch-tile rows (fits VMEM comfortably on all gens)


def _round_up(x, m):
    return ((x + m - 1) // m) * m


def _mlp_head_kernel(x_ref,
                     w1_ref, b1_ref,
                     w2_ref, b2_ref,
                     w3_ref, b3_ref,
                     w4_ref, b4_ref,
                     o_ref,
                     xpad_ref):
    # Fused 4-layer MLP head for one batch tile.  bf16 operands feed the MXU,
    # accumulation is f32; bias-add + ReLU run on the f32 accumulator (VPU),
    # activations are re-cast to bf16 between layers.  Dropout == identity.
    tb = xpad_ref.shape[0]

    # Cast raw f32 features to bf16 and zero-pad 1000 -> 1024 inside VMEM.
    # The tail columns are (re)zeroed every step so this stays correct if the
    # batch grid axis is sharded across TensorCores; the cost is a tiny masked
    # store, negligible next to the layer-1 matmul.
    xpad_ref[:, F_IN:] = jnp.zeros((tb, F_PAD - F_IN), jnp.bfloat16)
    xpad_ref[:, :F_IN] = x_ref[...].astype(jnp.bfloat16)
    x = xpad_ref[...]                                          # bf16 [TB, 1024]

    h = jnp.dot(x, w1_ref[...], preferred_element_type=jnp.float32) + b1_ref[...]
    h = jnp.maximum(h, 0.0)

    h = jnp.dot(h.astype(jnp.bfloat16), w2_ref[...],
                preferred_element_type=jnp.float32) + b2_ref[...]
    h = jnp.maximum(h, 0.0)

    h = jnp.dot(h.astype(jnp.bfloat16), w3_ref[...],
                preferred_element_type=jnp.float32) + b3_ref[...]
    h = jnp.maximum(h, 0.0)

    h = jnp.dot(h.astype(jnp.bfloat16), w4_ref[...],
                preferred_element_type=jnp.float32) + b4_ref[...]
    # bf16, lane-dense (c_pad multiple of 128) -> unmasked vst path.
    o_ref[...] = h.astype(o_ref.dtype)


def classifier_head(features, params, num_classes):
    """features: [B, 1000] f32 (raw backbone output).
    params: dict of padded (bf16 W [in,out], f32 b [1,out])."""
    B, f_in = features.shape
    assert f_in == F_IN

    w1, b1 = params["l1"]
    w2, b2 = params["l2"]
    w3, b3 = params["l3"]
    w4, b4 = params["l4"]
    c_pad = w4.shape[1]                      # num_classes rounded up to 128

    # Batch tile: as large as comfortably fits VMEM (<= 512 rows).  For
    # B >= 16 keep at least 2 tiles so both v7x TensorCores get work; tiny
    # batches use a single full-extent tile (block dim == full array dim).
    if B < 2 * SUBLANE:
        TB = B
    else:
        TB = min(TB_MAX, _round_up(pl.cdiv(B, 2), SUBLANE))
    grid = (pl.cdiv(B, TB),)
    # Ragged last tile (when TB does not divide B): OOB rows are read as
    # unspecified values and OOB output rows are discarded, so no wrapper-side
    # batch padding (and no extra HBM pass) is needed.

    # Weights/biases use a constant index_map so they are fetched once and
    # stay VMEM-resident across the batch grid.
    resident = lambda shape: pl.BlockSpec(shape, lambda i: (0, 0))

    flops = 2 * B * (F_PAD * 512 + 512 * 256 + 256 * 128 + 128 * c_pad)
    bytes_accessed = (
        features.size * features.dtype.itemsize
        + sum(a.size * a.dtype.itemsize
              for a in (w1, b1, w2, b2, w3, b3, w4, b4))
        + B * c_pad * 2)                     # bf16 output writeback

    out = pl.pallas_call(
        _mlp_head_kernel,
        out_shape=jax.ShapeDtypeStruct((B, c_pad), jnp.bfloat16),
        grid=grid,
        in_specs=[
            pl.BlockSpec((TB, F_IN), lambda i: (i, 0)),   # raw f32 features
            resident(w1.shape), resident(b1.shape),       # VMEM-resident weights
            resident(w2.shape), resident(b2.shape),
            resident(w3.shape), resident(b3.shape),
            resident(w4.shape), resident(b4.shape),
        ],
        out_specs=pl.BlockSpec((TB, c_pad), lambda i: (i, 0)),
        scratch_shapes=[pltpu.VMEM((TB, F_PAD), jnp.bfloat16)],
        compiler_params=pltpu.CompilerParams(
            dimension_semantics=("parallel",),            # megacore on v7x
            vmem_limit_bytes=32 * 1024 * 1024),           # headroom for v5e
        cost_estimate=pl.CostEstimate(
            flops=flops, transcendentals=0, bytes_accessed=bytes_accessed),
    )(features, w1, b1, w2, b2, w3, b3, w4, b4)

    return out[:, :num_classes].astype(jnp.float32)


def init_params(key, num_classes):
    """nn.Linear-style init (U[-1/sqrt(fan_in), +]), stored [in, out],
    zero-padded to TPU-aligned shapes, weights cast to bf16 for bandwidth."""
    c_pad = _round_up(num_classes, LANE)
    dims = [("l1", F_IN, 512, F_PAD, 512),
            ("l2", 512, 256, 512, 256),
            ("l3", 256, 128, 256, 128),
            ("l4", 128, num_classes, 128, c_pad)]
    params = {}
    for name, fan_in, fan_out, in_pad, out_pad in dims:
        key, kw, kb = jax.random.split(key, 3)
        bound = 1.0 / jnp.sqrt(fan_in)
        w = jax.random.uniform(kw, (fan_in, fan_out), jnp.float32, -bound, bound)
        b = jax.random.uniform(kb, (fan_out,), jnp.float32, -bound, bound)
        w_p = jnp.zeros((in_pad, out_pad), jnp.float32).at[:fan_in, :fan_out].set(w)
        b_p = jnp.zeros((1, out_pad), jnp.float32).at[0, :fan_out].set(b)
        params[name] = (w_p.astype(jnp.bfloat16), b_p)     # bf16 W, f32 bias
    return params


def reference_head(features, params, num_classes):
    """Pure-JAX reference with the same bf16 rounding as the kernel."""
    h = features.astype(jnp.bfloat16)
    h = jnp.concatenate(
        [h, jnp.zeros((h.shape[0], F_PAD - F_IN), jnp.bfloat16)], axis=1)
    for name in ("l1", "l2", "l3"):
        w, b = params[name]
        h = jnp.maximum(jnp.dot(h, w, preferred_element_type=jnp.float32) + b, 0.0)
        h = h.astype(jnp.bfloat16)
    w, b = params["l4"]
    out = jnp.dot(h, w, preferred_element_type=jnp.float32) + b
    out = out.astype(jnp.bfloat16)          # match the kernel's bf16 store
    return out[:, :num_classes].astype(jnp.float32)


if __name__ == "__main__":
    key = jax.random.PRNGKey(0)
    k_feat, k_params = jax.random.split(key)

    B = 32
    NUM_CLASSES = 10

    # Stand-in for the backbone output (torchvision models emit 1000 logits).
    features = jax.random.normal(k_feat, (B, F_IN), jnp.float32)
    params = init_params(k_params, NUM_CLASSES)

    out = jax.block_until_ready(classifier_head(features, params, NUM_CLASSES))
    ref = jax.block_until_ready(reference_head(features, params, NUM_CLASSES))

    assert out.shape == (B, NUM_CLASSES)
    assert jnp.allclose(out, ref, atol=2e-2, rtol=2e-2), \
        float(jnp.max(jnp.abs(out - ref)))

    print("KERNEL_OK")
</pallas_src>

<mosaic_0001>
module attributes {stable_mosaic.version = 11 : i64} {
  func.func @_mlp_head_kernel(%arg0: i32, %arg1: memref<16x1000xf32, #tpu.memory_space<vmem>>, %arg2: memref<1024x512xbf16, #tpu.memory_space<vmem>>, %arg3: memref<1x512xf32, #tpu.memory_space<vmem>>, %arg4: memref<512x256xbf16, #tpu.memory_space<vmem>>, %arg5: memref<1x256xf32, #tpu.memory_space<vmem>>, %arg6: memref<256x128xbf16, #tpu.memory_space<vmem>>, %arg7: memref<1x128xf32, #tpu.memory_space<vmem>>, %arg8: memref<128x128xbf16, #tpu.memory_space<vmem>>, %arg9: memref<1x128xf32, #tpu.memory_space<vmem>>, %arg10: memref<16x128xbf16, #tpu.memory_space<vmem>>, %arg11: memref<16x1024xbf16, #tpu.memory_space<vmem>>) attributes {dimension_semantics = [#tpu.dimension_semantics<parallel>], iteration_bounds = array<i64: 2>, scalar_prefetch = 0 : i64, scratch_operands = 1 : i64, tpu.core_type = #tpu.core_type<tc>, window_params = [{transform_indices = @transform_0, window_bounds = array<i64: 16, 1000>}, {pipeline_mode = #tpu.pipeline_mode<synchronous>, transform_indices = @transform_1, window_bounds = array<i64: 1024, 512>}, {pipeline_mode = #tpu.pipeline_mode<synchronous>, transform_indices = @transform_2, window_bounds = array<i64: 1, 512>}, {pipeline_mode = #tpu.pipeline_mode<synchronous>, transform_indices = @transform_3, window_bounds = array<i64: 512, 256>}, {pipeline_mode = #tpu.pipeline_mode<synchronous>, transform_indices = @transform_4, window_bounds = array<i64: 1, 256>}, {pipeline_mode = #tpu.pipeline_mode<synchronous>, transform_indices = @transform_5, window_bounds = array<i64: 256, 128>}, {pipeline_mode = #tpu.pipeline_mode<synchronous>, transform_indices = @transform_6, window_bounds = array<i64: 1, 128>}, {pipeline_mode = #tpu.pipeline_mode<synchronous>, transform_indices = @transform_7, window_bounds = array<i64: 128, 128>}, {pipeline_mode = #tpu.pipeline_mode<synchronous>, transform_indices = @transform_8, window_bounds = array<i64: 1, 128>}, {transform_indices = @transform_9, window_bounds = array<i64: 16, 128>}]} {
    %cst = arith.constant 0.000000e+00 : bf16
    %0 = vector.broadcast %cst : bf16 to vector<16x24xbf16>
    %c0 = arith.constant 0 : index
    %c1000 = arith.constant 1000 : index
    %1 = vector.load %arg11[%c0, %c1000] : memref<16x1024xbf16, #tpu.memory_space<vmem>>, vector<16x24xbf16>
    tpu.vector_store %arg11[%c0, %c1000], %0 {strides = array<i32>} : memref<16x1024xbf16, #tpu.memory_space<vmem>>, vector<16x24xbf16>,
    %c0_0 = arith.constant 0 : index
    %c0_1 = arith.constant 0 : index
    %2 = vector.load %arg1[%c0_0, %c0_1] : memref<16x1000xf32, #tpu.memory_space<vmem>>, vector<16x1000xf32>
    %3 = arith.truncf %2 : vector<16x1000xf32> to vector<16x1000xbf16>
    %c0_2 = arith.constant 0 : index
    %c0_3 = arith.constant 0 : index
    %4 = vector.load %arg11[%c0_2, %c0_3] : memref<16x1024xbf16, #tpu.memory_space<vmem>>, vector<16x1000xbf16>
    tpu.vector_store %arg11[%c0_2, %c0_3], %3 {strides = array<i32>} : memref<16x1024xbf16, #tpu.memory_space<vmem>>, vector<16x1000xbf16>,
    %c0_4 = arith.constant 0 : index
    %c0_5 = arith.constant 0 : index
    %5 = vector.load %arg11[%c0_4, %c0_5] : memref<16x1024xbf16, #tpu.memory_space<vmem>>, vector<16x1024xbf16>
    %c0_6 = arith.constant 0 : index
    %c0_7 = arith.constant 0 : index
    %6 = vector.load %arg2[%c0_6, %c0_7] : memref<1024x512xbf16, #tpu.memory_space<vmem>>, vector<1024x512xbf16>
    %cst_8 = arith.constant dense<0.000000e+00> : vector<16x512xf32>
    %7 = tpu.matmul %5, %6, %cst_8 {dimension_numbers = #tpu.dot_dimension_numbers<[1], [0], [0], [1], [0, 0, 1, 1], [], []>} : vector<16x1024xbf16>, vector<1024x512xbf16>, vector<16x512xf32> -> vector<16x512xf32>
    %c0_9 = arith.constant 0 : index
    %c0_10 = arith.constant 0 : index
    %8 = vector.load %arg3[%c0_9, %c0_10] : memref<1x512xf32, #tpu.memory_space<vmem>>, vector<1x512xf32>
    %9 = vector.broadcast %8 : vector<1x512xf32> to vector<16x512xf32>
    %10 = arith.addf %7, %9 : vector<16x512xf32>
    %cst_11 = arith.constant 0.000000e+00 : f32
    %11 = vector.broadcast %cst_11 : f32 to vector<16x512xf32>
    %12 = arith.maximumf %10, %11 : vector<16x512xf32>
    %13 = arith.truncf %12 : vector<16x512xf32> to vector<16x512xbf16>
    %c0_12 = arith.constant 0 : index
    %c0_13 = arith.constant 0 : index
    %14 = vector.load %arg4[%c0_12, %c0_13] : memref<512x256xbf16, #tpu.memory_space<vmem>>, vector<512x256xbf16>
    %cst_14 = arith.constant dense<0.000000e+00> : vector<16x256xf32>
    %15 = tpu.matmul %13, %14, %cst_14 {dimension_numbers = #tpu.dot_dimension_numbers<[1], [0], [0], [1], [0, 0, 1, 1], [], []>} : vector<16x512xbf16>, vector<512x256xbf16>, vector<16x256xf32> -> vector<16x256xf32>
    %c0_15 = arith.constant 0 : index
    %c0_16 = arith.constant 0 : index
    %16 = vector.load %arg5[%c0_15, %c0_16] : memref<1x256xf32, #tpu.memory_space<vmem>>, vector<1x256xf32>
    %17 = vector.broadcast %16 : vector<1x256xf32> to vector<16x256xf32>
    %18 = arith.addf %15, %17 : vector<16x256xf32>
    %cst_17 = arith.constant 0.000000e+00 : f32
    %19 = vector.broadcast %cst_17 : f32 to vector<16x256xf32>
    %20 = arith.maximumf %18, %19 : vector<16x256xf32>
    %21 = arith.truncf %20 : vector<16x256xf32> to vector<16x256xbf16>
    %c0_18 = arith.constant 0 : index
    %c0_19 = arith.constant 0 : index
    %22 = vector.load %arg6[%c0_18, %c0_19] : memref<256x128xbf16, #tpu.memory_space<vmem>>, vector<256x128xbf16>
    %cst_20 = arith.constant dense<0.000000e+00> : vector<16x128xf32>
    %23 = tpu.matmul %21, %22, %cst_20 {dimension_numbers = #tpu.dot_dimension_numbers<[1], [0], [0], [1], [0, 0, 1, 1], [], []>} : vector<16x256xbf16>, vector<256x128xbf16>, vector<16x128xf32> -> vector<16x128xf32>
    %c0_21 = arith.constant 0 : index
    %c0_22 = arith.constant 0 : index
    %24 = vector.load %arg7[%c0_21, %c0_22] : memref<1x128xf32, #tpu.memory_space<vmem>>, vector<1x128xf32>
    %25 = vector.broadcast %24 : vector<1x128xf32> to vector<16x128xf32>
    %26 = arith.addf %23, %25 : vector<16x128xf32>
    %cst_23 = arith.constant 0.000000e+00 : f32
    %27 = vector.broadcast %cst_23 : f32 to vector<16x128xf32>
    %28 = arith.maximumf %26, %27 : vector<16x128xf32>
    %29 = arith.truncf %28 : vector<16x128xf32> to vector<16x128xbf16>
    %c0_24 = arith.constant 0 : index
    %c0_25 = arith.constant 0 : index
    %30 = vector.load %arg8[%c0_24, %c0_25] : memref<128x128xbf16, #tpu.memory_space<vmem>>, vector<128x128xbf16>
    %cst_26 = arith.constant dense<0.000000e+00> : vector<16x128xf32>
    %31 = tpu.matmul %29, %30, %cst_26 {dimension_numbers = #tpu.dot_dimension_numbers<[1], [0], [0], [1], [0, 0, 1, 1], [], []>} : vector<16x128xbf16>, vector<128x128xbf16>, vector<16x128xf32> -> vector<16x128xf32>
    %c0_27 = arith.constant 0 : index
    %c0_28 = arith.constant 0 : index
    %32 = vector.load %arg9[%c0_27, %c0_28] : memref<1x128xf32, #tpu.memory_space<vmem>>, vector<1x128xf32>
    %33 = vector.broadcast %32 : vector<1x128xf32> to vector<16x128xf32>
    %34 = arith.addf %31, %33 : vector<16x128xf32>
    %35 = arith.truncf %34 : vector<16x128xf32> to vector<16x128xbf16>
    %c0_29 = arith.constant 0 : index
    %c0_30 = arith.constant 0 : index
    %36 = vector.load %arg10[%c0_29, %c0_30] : memref<16x128xbf16, #tpu.memory_space<vmem>>, vector<16x128xbf16>
    tpu.vector_store %arg10[%c0_29, %c0_30], %35 {strides = array<i32>} : memref<16x128xbf16, #tpu.memory_space<vmem>>, vector<16x128xbf16>,
    return
  }
  func.func @transform_0(%arg0: i32) -> (i32, i32) {
    %c0_i32 = arith.constant 0 : i32
    %c0_i32_0 = arith.constant 0 : i32
    return %arg0, %c0_i32 : i32, i32
  }
  func.func @transform_1(%arg0: i32) -> (i32, i32) {
    %c0_i32 = arith.constant 0 : i32
    %c0_i32_0 = arith.constant 0 : i32
    %c0_i32_1 = arith.constant 0 : i32
    return %c0_i32, %c0_i32_0 : i32, i32
  }
  func.func @transform_2(%arg0: i32) -> (i32, i32) {
    %c0_i32 = arith.constant 0 : i32
    %c0_i32_0 = arith.constant 0 : i32
    %c0_i32_1 = arith.constant 0 : i32
    return %c0_i32, %c0_i32_0 : i32, i32
  }
  func.func @transform_3(%arg0: i32) -> (i32, i32) {
    %c0_i32 = arith.constant 0 : i32
    %c0_i32_0 = arith.constant 0 : i32
    %c0_i32_1 = arith.constant 0 : i32
    return %c0_i32, %c0_i32_0 : i32, i32
  }
  func.func @transform_4(%arg0: i32) -> (i32, i32) {
    %c0_i32 = arith.constant 0 : i32
    %c0_i32_0 = arith.constant 0 : i32
    %c0_i32_1 = arith.constant 0 : i32
    return %c0_i32, %c0_i32_0 : i32, i32
  }
  func.func @transform_5(%arg0: i32) -> (i32, i32) {
    %c0_i32 = arith.constant 0 : i32
    %c0_i32_0 = arith.constant 0 : i32
    %c0_i32_1 = arith.constant 0 : i32
    return %c0_i32, %c0_i32_0 : i32, i32
  }
  func.func @transform_6(%arg0: i32) -> (i32, i32) {
    %c0_i32 = arith.constant 0 : i32
    %c0_i32_0 = arith.constant 0 : i32
    %c0_i32_1 = arith.constant 0 : i32
    return %c0_i32, %c0_i32_0 : i32, i32
  }
  func.func @transform_7(%arg0: i32) -> (i32, i32) {
    %c0_i32 = arith.constant 0 : i32
    %c0_i32_0 = arith.constant 0 : i32
    %c0_i32_1 = arith.constant 0 : i32
    return %c0_i32, %c0_i32_0 : i32, i32
  }
  func.func @transform_8(%arg0: i32) -> (i32, i32) {
    %c0_i32 = arith.constant 0 : i32
    %c0_i32_0 = arith.constant 0 : i32
    %c0_i32_1 = arith.constant 0 : i32
    return %c0_i32, %c0_i32_0 : i32, i32
  }
  func.func @transform_9(%arg0: i32) -> (i32, i32) {
    %c0_i32 = arith.constant 0 : i32
    %c0_i32_0 = arith.constant 0 : i32
    return %arg0, %c0_i32 : i32, i32
  }
}

</mosaic_0001>

<bundles_post_ra>
// kernel: tpu_custom_call.1
= control target key start
LH: loop header
LB: loop body
LE: loop exit
PB: predicated region body
PF: predicated region fallthrough
CT: control target
= control target key end

     0   :  { %s4986_s0 = inlined_call_operand.hbm [shape: f32[32,1000], index: 0, kind: input, shape index: {}]   ;;  %s4987_s1 = inlined_call_operand.hbm [shape: bf16[1024,512], index: 1, kind: input, shape index: {}]   ;;  %s4988_s2 = inlined_call_operand.vmem [shape: f32[1,512], index: 2, kind: input, shape index: {}]   ;;  %s4989_s3 = inlined_call_operand.hbm [shape: bf16[512,256], index: 3, kind: input, shape index: {}]   ;;  %s4990_s4 = inlined_call_operand.vmem [shape: f32[1,256], index: 4, kind: input, shape index: {}]   ;;  %s4991_s5 = inlined_call_operand.hbm [shape: bf16[256,128], index: 5, kind: input, shape index: {}]   ;;  %s4992_s6 = inlined_call_operand.vmem [shape: f32[1,128], index: 6, kind: input, shape index: {}]   ;;  %s4993_s7 = inlined_call_operand.hbm [shape: bf16[128,128], index: 7, kind: input, shape index: {}]   ;;  %s4994_s8 = inlined_call_operand.vmem [shape: f32[1,128], index: 8, kind: input, shape index: {}]   ;;  %s4995_s9 = inlined_call_operand.hbm [shape: bf16[32,128], index: 9, kind: output, shape index: {}]  }
   0x1   :  { %5004 = sst [smem:[#allocation19_spill]] %s4987_s1 }
   0x2   :  { %14 = vsyncpa [#allocation4], 0 }
   0x3   :  { %16 = vsyncpa [#allocation4 + $0x1], 0 }
   0x4   :  { %17 = vsyncpa [#allocation7], 0 }
   0x5   :  { %18 = vsyncpa [#allocation10], 0 }
   0x6   :  { %19 = vsyncpa [#allocation5], 0 }
   0x7   :  { %21 = vsyncpa [#allocation5 + $0x1], 0  ;;  %s4645_s30 = smov 0   ;;  %s4647_s10 = smov 0  }
   0x8   :  { %s4649_s11 = smov 0   ;;  %s4651_s12 = smov 0  }
   0x9 LB: > { %5005 = sst [smem:[#allocation17_spill]] %s4563_s30  ;;  %s4666_s13 = sadd.s32 4294967295, %s4575_s12   ;;  %s4575_s12 = sphi %s4651_s12, %s5031_s12   ;;  %s4571_s11 = sphi %s4649_s11, %s5030_s11   ;;  %s4567_s10 = sphi %s4647_s10, %s5029_s10   ;;  %s4563_s30 = sphi %s4645_s30, %s5028_s30  }
   0xa   : > { %s3284_s14 = sadd.s32 4294967294, %s4575_s12   ;;  %p47_p0 = scmp.ne.s32.totalorder %s4567_s10, %s4563_s30 }
   0xb   : > { %p4996_p1 = scmp.eq.s32.totalorder %s4666_s13, 0  ;;  %p245_p3 = scmp.eq.s32.totalorder %s3284_s14, 1 }
   0xc   : > { %p3285_p5 = scmp.ge.s32.totalorder %s4575_s12, 1  ;;  %p252_p7 = scmp.lt.s32.totalorder %s4575_s12, 3 }
   0xd   : > { %p4675_p4 = por %p4996_p1, %p47_p0  ;;  %p4680_p6 = por %p245_p3, %p47_p0 }
   0xe   : > { %p4685_p8 = pnand %p3285_p5, %p252_p7  ;;  %s4577_s18 = smov [#allocation6]  }
   0xf   : > { %s5006_s15 = scalar_select %p4675_p4, 1, 0 }
  0x10   : > { %s5007_s16 = scalar_select %p4680_p6, 1, 0 }
  0x11   : > { %s5009_s17 = scalar_select %p4685_p8, 1, 0 }
  0x12   : > { %5008 = sst [smem:[#allocation18_spill]] %s5007_s16  ;;  %s264_s19 = sshll.u32 %s4577_s18, 4  ;;  %s4689_s19 = int_to_ptr.vmem [resolvable:$true] %s264_s19 }
  0x13   : > { %p3776_p9 = pneg %p4685_p8  ;;  %s4578_s21 = smov [#allocation9]  }
  0x14   : > { %s296_s22 = sshll.u32 %s4578_s21, 4  ;;  %s5011_s1 = sld [smem:[#allocation19_spill]]  ;;  %s4700_s22 = int_to_ptr.vmem [resolvable:$true] %s296_s22 }
  0x15   : > { %p4696_p11 = pnand %p3776_p9, %p4996_p1 }
  0x17   : > { %p4710_p13 = pneg %p4696_p11 }
  0x1a   : > { %s4359_s25 = scalar_lea.hbm %s5011_s1, 32768 }
  0x1b   : > { %p4360_p12 = scmp.ne.s32.totalorder %s5011_s1, %s4359_s25  ;;  %p4366_p5 = scmp.lt.u32.totalorder %s4359_s25, %s5011_s1 }
  0x1d   : > { %p4362_p0 = pnand %p4710_p13, %p4360_p12 }
  0x1f   : > { %p4363_p3 = pneg %p4362_p0 }
  0x21   : > { %p4368_p7 = pnand %p4366_p5, %p4363_p3 }
  0x23   : > { %4371 = shalt.err (!%p4368_p7)
}
  0x24   : > { %s4372_s18 = scalar_lea.vmem %s4689_s19, 32768  ;;  %p4380_p2 = scmp.lt.s32.totalorder %s4689_s19, %s4689_s19 }
  0x25   : > { %p4373_p9 = scmp.ne.s32.totalorder %s4689_s19, %s4372_s18  ;;  %p4381_p6 = scmp.lt.s32.totalorder %s4372_s18, %s4372_s18 }
  0x27   : > { %p4375_p10 = pnand %p4373_p9, %p4710_p13  ;;  %p4382_p12 = por %p4381_p6, %p4380_p2 }
  0x29   : > { %p4376_p1 = pneg %p4375_p10 }
  0x2b   : > { %p4383_p0 = pnand %p4382_p12, %p4376_p1 }
  0x2d   : > { %4386 = shalt.err (!%p4383_p0)
}
  0x2e   : > { %s4579_s21 = smov 256   ;;  %s4580_s23 = smov 16  }
  0x2f   : > { %3779 = dma.hbm_to_vmem [thread:$0]  (!%p4696_p11), %s5011_s1, 32768, %s4689_s19, [#allocation7], %s4579_s21, %s4579_s21, %s4580_s23  }
  0x30   : > { %s4387_s29 = scalar_lea.hbm %s4991_s5, 2048 }
  0x31   : > { %p4388_p2 = scmp.ne.s32.totalorder %s4991_s5, %s4387_s29  ;;  %p4394_p10 = scmp.lt.u32.totalorder %s4387_s29, %s4991_s5 }
  0x33   : > { %p4390_p1 = pnand %p4388_p2, %p4710_p13 }
  0x35   : > { %p4391_p6 = pneg %p4390_p1 }
  0x37   : > { %p4396_p3 = pnand %p4394_p10, %p4391_p6 }
  0x39   : > { %4399 = shalt.err (!%p4396_p3)
}
  0x3a   : > { %s4400_s19 = scalar_lea.vmem %s4700_s22, 2048  ;;  %p4408_p12 = scmp.lt.s32.totalorder %s4700_s22, %s4700_s22 }
  0x3b   : > { %p4401_p5 = scmp.ne.s32.totalorder %s4700_s22, %s4400_s19  ;;  %p4409_p0 = scmp.lt.s32.totalorder %s4400_s19, %s4400_s19 }
  0x3d   : > { %p4403_p7 = pnand %p4401_p5, %p4710_p13  ;;  %p4410_p2 = por %p4409_p0, %p4408_p12 }
  0x3f   : > { %p4404_p9 = pneg %p4403_p7 }
  0x41   : > { %p4411_p1 = pnand %p4410_p2, %p4404_p9 }
  0x43   : > { %4414 = shalt.err (!%p4411_p1)
}
  0x44   : > { %s5001_s16 = smov 64   ;;  %s5003_s30 = smov 4  }
  0x45   : > { %3785 = dma.hbm_to_vmem [thread:$0]  (!%p4696_p11), %s4991_s5, 2048, %s4700_s22, [#allocation10], %s5001_s16, %s5001_s16, %s5003_s30  }
  0x46   : > { %s4583_s24 = smov [#allocation8]   ;;  %s4415_s29 = scalar_lea.hbm %s4989_s3, 8192 }
  0x47   : > { %s280_s25 = sshll.u32 %s4583_s24, 4  ;;  %p4416_p6 = scmp.ne.s32.totalorder %s4989_s3, %s4415_s29  ;;  %s281_s25 = int_to_ptr.vmem [resolvable:$true] %s280_s25 }
  0x48   : > { %p4422_p5 = scmp.lt.u32.totalorder %s4415_s29, %s4989_s3 }
  0x49   : > { %p4418_p10 = pnand %p4416_p6, %p4710_p13 }
  0x4b   : > { %p4419_p3 = pneg %p4418_p10 }
  0x4d   : > { %p4424_p7 = pnand %p4422_p5, %p4419_p3 }
  0x4f   : > { %4427 = shalt.err (!%p4424_p7)
}
  0x50   : > { %s4428_s22 = scalar_lea.vmem %s281_s25, 8192  ;;  %p4436_p2 = scmp.lt.s32.totalorder %s281_s25, %s281_s25 }
  0x51   : > { %p4429_p9 = scmp.ne.s32.totalorder %s281_s25, %s4428_s22  ;;  %p4437_p1 = scmp.lt.s32.totalorder %s4428_s22, %s4428_s22 }
  0x53   : > { %p4431_p12 = pnand %p4429_p9, %p4710_p13  ;;  %p4438_p4 = por %p4437_p1, %p4436_p2 }
  0x55   : > { %p4432_p0 = pneg %p4431_p12 }
  0x57   : > { %p4439_p8 = pnand %p4438_p4, %p4432_p0 }
  0x59   : > { %4442 = shalt.err (!%p4439_p8)
}
  0x5a   : > { %s4584_s21 = smov 128   ;;  %s4585_s23 = smov 8  }
  0x5b   : > { %3782 = dma.hbm_to_vmem [thread:$0]  (!%p4696_p11), %s4989_s3, 8192, %s281_s25, [#allocation7], %s4584_s21, %s4584_s21, %s4585_s23  }
  0x5c   : > { %s4586_s26 = smov [#allocation11]   ;;  %s4443_s18 = scalar_lea.hbm %s4993_s7, 1024 }
  0x5d   : > { %s312_s27 = sshll.u32 %s4586_s26, 4  ;;  %p4444_p4 = scmp.ne.s32.totalorder %s4993_s7, %s4443_s18  ;;  %s313_s27 = int_to_ptr.vmem [resolvable:$true] %s312_s27 }
  0x5e   : > { %p4450_p10 = scmp.lt.u32.totalorder %s4443_s18, %s4993_s7 }
  0x5f   : > { %p4446_p8 = pnand %p4444_p4, %p4710_p13 }
  0x61   : > { %p4447_p6 = pneg %p4446_p8 }
  0x63   : > { %p4452_p3 = pnand %p4450_p10, %p4447_p6 }
  0x65   : > { %4455 = shalt.err (!%p4452_p3)
}
  0x66   : > { %s4456_s25 = scalar_lea.vmem %s313_s27, 1024  ;;  %p4464_p12 = scmp.lt.s32.totalorder %s313_s27, %s313_s27 }
  0x67   : > { %p4457_p5 = scmp.ne.s32.totalorder %s313_s27, %s4456_s25  ;;  %p4465_p0 = scmp.lt.s32.totalorder %s4456_s25, %s4456_s25 }
  0x69   : > { %p4459_p7 = pnand %p4457_p5, %p4710_p13  ;;  %p4466_p2 = por %p4465_p0, %p4464_p12 }
  0x6b   : > { %p4460_p9 = pneg %p4459_p7 }
  0x6d   : > { %p4467_p1 = pnand %p4466_p2, %p4460_p9 }
  0x6f   : > { %4470 = shalt.err (!%p4467_p1)
}
  0x70   : > { %s5013_s21 = smov 4   ;;  %s5014_s23 = smov 64  }
  0x71   : > { %3788 = dma.hbm_to_vmem [thread:$0]  (!%p4696_p11), %s4993_s7, 1024, %s313_s27, [#allocation10], %s5014_s23, %s5014_s23, %s5013_s21  }
  0x72   : > { %s4797_s28 = sadd.s32 1, %s4575_s12   ;;  %s34_s20 = sadd.s32 1, %s4571_s11 }
  0x73   : > { %s31_s1 = ssub.s32 %s4575_s12, %s4797_s28  ;;  %p41_p13 = scmp.ne.s32.totalorder %s4571_s11, %s4567_s10 }
  0x74   : > { %p32_p4 = scmp.eq.s32.totalorder %s31_s1, 0  ;;  %p42_p8 = scmp.eq.s32.totalorder %s4575_s12, 0 }
  0x75   : > { %p5015_p6 = scmp.eq.s32.totalorder %s4666_s13, 1  ;;  %p3801_p3 = scmp.lt.s32.totalorder %s4575_s12, 2 }
  0x76   : > { %s4813_s26 = scalar_select %p32_p4, %s4571_s11, %s34_s20  }
  0x77   : > { %p4807_p10 = por %p5015_p6, %p41_p13  ;;  %p43_p5 = por %p42_p8, %p41_p13 }
  0x78   : > { %s329_s29 = sand.u32 1, %s4571_s11   ;;  %s3656_s27 = sshll.u32 %s4575_s12, 11 }
  0x79   : > { %s3291_s14 = sshll.u32 %s329_s29, 7  ;;  %s4820_s22 = scalar_lea.hbm %s4986_s0, %s3656_s27 }
  0x7a   : > { %s333_s25 = scalar_lea.vmem [#allocation3], %s3291_s14  ;;  %p4824_p11 = pnand %p3801_p3, %p43_p5 }
  0x7b   : > { %s341_s21 = sshll.u32 %s333_s25, 4  ;;  %s4828_s30 = scalar_lea.sflag [#allocation4], %s329_s29  ;;  %s4822_s21 = int_to_ptr.vmem [resolvable:$true] %s341_s21 }
  0x7c   : > { %s4471_s20 = scalar_lea.hbm %s4820_s22, 2048  ;;  %p4473_p9 = pneg %p4824_p11 }
  0x7d   : > { %p4472_p7 = scmp.ne.s32.totalorder %s4820_s22, %s4471_s20  ;;  %s4476_s27 = scalar_lea.hbm %s4986_s0, 4096 }
  0x7e   : > { %p4477_p2 = scmp.lt.u32.totalorder %s4820_s22, %s4986_s0  ;;  %p4478_p1 = scmp.lt.u32.totalorder %s4476_s27, %s4471_s20 }
  0x7f   : > { %p4474_p12 = pnand %p4473_p9, %p4472_p7  ;;  %p4480_p4 = scmp.lt.u32.totalorder %s4471_s20, %s4820_s22 }
  0x80   : > { %p4479_p13 = por %p4478_p1, %p4477_p2 }
  0x81   : > { %p4475_p0 = pneg %p4474_p12 }
  0x82   : > { %p4481_p8 = por %p4480_p4, %p4479_p13 }
  0x84   : > { %p4482_p6 = pnand %p4481_p8, %p4475_p0 }
  0x86   : > { %4485 = shalt.err (!%p4482_p6)
}
  0x87   : > { %s4486_s29 = scalar_lea.vmem %s4822_s21, 2048  ;;  %s4587_s25 = smov [#allocation3]  }
  0x88   : > { %p4487_p3 = scmp.ne.s32.totalorder %s4822_s21, %s4486_s29  ;;  %s4491_s1 = sshll.u32 %s4587_s25, 4  ;;  %s4492_s1 = int_to_ptr.vmem [resolvable:$false] %s4491_s1 }
  0x89   : > { %s4493_s14 = scalar_lea.vmem %s4492_s1, 4096  ;;  %p4494_p12 = scmp.lt.s32.totalorder %s4822_s21, %s4492_s1 }
  0x8a   : > { %p4489_p5 = pnand %p4487_p3, %p4473_p9  ;;  %p4495_p2 = scmp.lt.s32.totalorder %s4493_s14, %s4486_s29 }
  0x8c   : > { %p4490_p7 = pneg %p4489_p5  ;;  %p4496_p1 = por %p4495_p2, %p4494_p12 }
  0x8e   : > { %p4497_p13 = pnand %p4496_p1, %p4490_p7 }
  0x90   : > { %4500 = shalt.err (!%p4497_p13)
}
  0x91   : > { %s4588_s20 = smov 1024   ;;  %p5018_p9 = scmp.ne.s32.totalorder %s5009_s17, 0 }
  0x92   : > { %3792 = dma.hbm_to_vmem [thread:$0]  (!%p4824_p11), %s4820_s22, 2048, %s4822_s21, %s4828_s30, %s4588_s20, %s4588_s20, %s5014_s23  }
  0x93   : > { %353 = sbr.rel (%p5018_p9) target bundleno = 1383 (0x567), region = 56  ;;  %s4860_s27 = sand.u32 (!%p5018_p9), 1, %s4567_s10  }
  0x94   : > { %s3296_s18 = sshll.u32 (!%p5018_p9), %s4860_s27, 7  ;;  %s356_s19 = scalar_lea.sflag (!%p5018_p9), [#allocation4], %s4860_s27 }
  0x95   : > { %s4864_s29 = scalar_lea.vmem (!%p5018_p9), [#allocation3], %s3296_s18  ;;  %p5019_p0 = scmp.ne.s32.totalorder (!%p5018_p9), %s5006_s15, 0 }
  0x9a   : > { %4546 = dma.done.wait (%p5019_p0), %s356_s19, 2048  }
  0x9b   : > { %4548 = vsyncadd (%p5019_p0), %s356_s19, 4294965248  ;;  %p5020_p11 = scmp.eq.s32.totalorder %s4666_s13, 0 }
  0x9d   : > { %4550 = dma.done.wait (%p5020_p11), [#allocation7], 40960   ;;  %p5021_p4 = pmov %p5020_p11 }
  0x9f   : > { %4552 = vsyncadd (%p5021_p4), [#allocation7], 4294926336  ;;  %p5022_p8 = pmov %p5021_p4 }
  0xa0   : > { %p5023_p6 = pmov %p5021_p4 }
  0xa1   : > { %4554 = dma.done.wait (%p5022_p8), [#allocation10], 3072  }
  0xa2   : > { %4556 = vsyncadd (%p5023_p6), [#allocation10], 4294964224  ;;  %v3855_v0 = vld [vmem:[#allocation6 + $0x4] ss:$16 sps:$4 sm:$0xff]   ;;  %v3857_v1 = vld [vmem:[#allocation6 + $0xc] ss:$16 sps:$4 sm:$0xff]  }
  0xa3   : > { %2014 = vmatprep.subr.bf16.mxu0 %v3855_v0  ;;  %v3859_v2 = vld [vmem:[#allocation6] ss:$16 sps:$4 sm:$0xff]   ;;  %v3860_v3 = vld [vmem:[#allocation6 + $0x8] ss:$16 sps:$4 sm:$0xff]   ;;  %2186 = vmatprep.subr.bf16.mxu1 %v3857_v1  ;;  %v3861_v4 = vld [vmem:[#allocation6 + $0x24] ss:$16 sps:$4 sm:$0xff]  }
  0xa4   : > { %2015 = vmatpush1.bf16.msra.mxu0 %v3859_v2  ;;  %2187 = vmatpush1.bf16.msra.mxu1 %v3860_v3  ;;  %v3863_v5 = vld [vmem:[#allocation6 + $0x2c] ss:$16 sps:$4 sm:$0xff]   ;;  %v3865_v6 = vld [vmem:[#allocation6 + $0x20] ss:$16 sps:$4 sm:$0xff]   ;;  %v3866_v7 = vld [vmem:[#allocation6 + $0x28] ss:$16 sps:$4 sm:$0xff]  }
  0xa5   : > { %2016 = vmatprep.subr.bf16.mxu0 %v3861_v4  ;;  %2188 = vmatprep.subr.bf16.mxu1 %v3863_v5  ;;  %v3867_v8 = vld [vmem:[#allocation6 + $0x44] ss:$16 sps:$4 sm:$0xff]   ;;  %v3869_v9 = vld [vmem:[#allocation6 + $0x4c] ss:$16 sps:$4 sm:$0xff]   ;;  %v3871_v10 = vld [vmem:[#allocation6 + $0x40] ss:$16 sps:$4 sm:$0xff]  }
  0xa6   : > { %v3872_v11 = vld [vmem:[#allocation6 + $0x48] ss:$16 sps:$4 sm:$0xff]   ;;  %v3873_v12 = vld [vmem:[#allocation6 + $0x64] ss:$16 sps:$4 sm:$0xff]   ;;  %v3875_v13 = vld [vmem:[#allocation6 + $0x6c] ss:$16 sps:$4 sm:$0xff]  }
  0xa7   : > { %v3877_v14 = vld [vmem:[#allocation6 + $0x60] ss:$16 sps:$4 sm:$0xff]   ;;  %v3878_v15 = vld [vmem:[#allocation6 + $0x68] ss:$16 sps:$4 sm:$0xff]   ;;  %v3879_v16 = vld [vmem:[#allocation6 + $0x84] ss:$16 sps:$4 sm:$0xff]  }
  0xa8   : > { %2017 = vmatpush1.bf16.msra.mxu0 %v3865_v6  ;;  %2189 = vmatpush1.bf16.msra.mxu1 %v3866_v7  ;;  %v3881_v17 = vld [vmem:[#allocation6 + $0x8c] ss:$16 sps:$4 sm:$0xff]   ;;  %v3883_v18 = vld [vmem:[#allocation6 + $0x80] ss:$16 sps:$4 sm:$0xff]   ;;  %v3884_v19 = vld [vmem:[#allocation6 + $0x88] ss:$16 sps:$4 sm:$0xff]  }
  0xa9   : > { %2018 = vmatprep.subr.bf16.mxu0 %v3867_v8  ;;  %2190 = vmatprep.subr.bf16.mxu1 %v3869_v9  ;;  %v3885_v20 = vld [vmem:[#allocation6 + $0xa4] ss:$16 sps:$4 sm:$0xff]   ;;  %v3887_v21 = vld [vmem:[#allocation6 + $0xac] ss:$16 sps:$4 sm:$0xff]   ;;  %v3889_v22 = vld [vmem:[#allocation6 + $0xa0] ss:$16 sps:$4 sm:$0xff]  }
  0xaa   : > { %v3890_v23 = vld [vmem:[#allocation6 + $0xa8] ss:$16 sps:$4 sm:$0xff]   ;;  %v3891_v24 = vld [vmem:[#allocation6 + $0xc4] ss:$16 sps:$4 sm:$0xff]   ;;  %v3893_v25 = vld [vmem:[#allocation6 + $0xcc] ss:$16 sps:$4 sm:$0xff]  }
  0xab   : > { %v3895_v26 = vld [vmem:[#allocation6 + $0xc0] ss:$16 sps:$4 sm:$0xff]   ;;  %v3896_v27 = vld [vmem:[#allocation6 + $0xc8] ss:$16 sps:$4 sm:$0xff]   ;;  %v3897_v28 = vld [vmem:[#allocation6 + $0xe4] ss:$16 sps:$4 sm:$0xff]  }
  0xac   : > { %2019 = vmatpush1.bf16.msra.mxu0 %v3871_v10  ;;  %2191 = vmatpush1.bf16.msra.mxu1 %v3872_v11  ;;  %v3899_v29 = vld [vmem:[#allocation6 + $0xec] ss:$16 sps:$4 sm:$0xff]   ;;  %v3901_v30 = vld [vmem:[#allocation6 + $0xe0] ss:$16 sps:$4 sm:$0xff]   ;;  %v3902_v31 = vld [vmem:[#allocation6 + $0xe8] ss:$16 sps:$4 sm:$0xff]  }
  0xad   : > { %2020 = vmatprep.subr.bf16.mxu0 %v3873_v12  ;;  %2192 = vmatprep.subr.bf16.mxu1 %v3875_v13  ;;  %v3903_v32 = vld [vmem:[#allocation6 + $0x104] ss:$16 sps:$4 sm:$0xff]   ;;  %v3905_v33 = vld [vmem:[#allocation6 + $0x10c] ss:$16 sps:$4 sm:$0xff]   ;;  %v3907_v34 = vld [vmem:[#allocation6 + $0x100] ss:$16 sps:$4 sm:$0xff]  }
  0xae   : > { %v3908_v35 = vld [vmem:[#allocation6 + $0x108] ss:$16 sps:$4 sm:$0xff]   ;;  %v3909_v36 = vld [vmem:[#allocation6 + $0x124] ss:$16 sps:$4 sm:$0xff]   ;;  %v3911_v37 = vld [vmem:[#allocation6 + $0x12c] ss:$16 sps:$4 sm:$0xff]  }
  0xaf   : > { %v3913_v38 = vld [vmem:[#allocation6 + $0x120] ss:$16 sps:$4 sm:$0xff]   ;;  %v3914_v39 = vld [vmem:[#allocation6 + $0x128] ss:$16 sps:$4 sm:$0xff]   ;;  %v3915_v40 = vld [vmem:[#allocation6 + $0x144] ss:$16 sps:$4 sm:$0xff]  }
  0xb0   : > { %2021 = vmatpush1.bf16.msra.mxu0 %v3877_v14  ;;  %2193 = vmatpush1.bf16.msra.mxu1 %v3878_v15  ;;  %v3917_v41 = vld [vmem:[#allocation6 + $0x14c] ss:$16 sps:$4 sm:$0xff]   ;;  %v3919_v42 = vld [vmem:[#allocation6 + $0x140] ss:$16 sps:$4 sm:$0xff]   ;;  %v3920_v43 = vld [vmem:[#allocation6 + $0x148] ss:$16 sps:$4 sm:$0xff]  }
  0xb1   : > { %2022 = vmatprep.subr.bf16.mxu0 %v3879_v16  ;;  %2194 = vmatprep.subr.bf16.mxu1 %v3881_v17  ;;  %v3921_v44 = vld [vmem:[#allocation6 + $0x164] ss:$16 sps:$4 sm:$0xff]   ;;  %v3923_v45 = vld [vmem:[#allocation6 + $0x16c] ss:$16 sps:$4 sm:$0xff]   ;;  %v3925_v48 = vld [vmem:[#allocation6 + $0x160] ss:$16 sps:$4 sm:$0xff]  }
  0xb2   : > { %v416_v46 = vld [vmem:[%s4864_s29 + $0x8] sm:$0xff]  ;;  %v3927_v51 = vld [vmem:[#allocation6 + $0x184] ss:$16 sps:$4 sm:$0xff]   ;;  %v3931_v55 = vld [vmem:[#allocation6 + $0x180] ss:$16 sps:$4 sm:$0xff]   ;;  %vm413_vm0 = vcmask 1048384  }
  0xb3   : > { %v424_v47 = vld [vmem:[%s4864_s29 + $0x48] sm:$0xff]  ;;  %v415_v53 = vld [vmem:[%s4864_s29] sm:$0xff]  ;;  %vm446_vm1 = vcmask 850944   ;;  %vm4591_vm2 = vmmov 0   ;;  %s3301_s30 = sshll.u32 %s4860_s27, 3  ;;  %s3659_s18 = sshll.u32 %s4666_s13, 7 }
  0xb4   : > { %2023 = vmatpush1.bf16.msra.mxu0 %v3883_v18  ;;  %2195 = vmatpush1.bf16.msra.mxu1 %v3884_v19  ;;  %v3926_v49 = vld [vmem:[#allocation6 + $0x168] ss:$16 sps:$4 sm:$0xff]   ;;  %v432_v50 = vpack.c.bf16 %v424_v47, %v416_v46  ;;  %v3929_v52 = vld [vmem:[#allocation6 + $0x18c] ss:$16 sps:$4 sm:$0xff]   ;;  %v423_v54 = vld [vmem:[%s4864_s29 + $0x40] sm:$0xff]  ;;  %s409_s14 = scalar_lea.vmem [#allocation12], %s3301_s30  ;;  %s4942_s15 = scalar_lea.hbm %s4995_s9, %s3659_s18 }
  0xb5   : > { %2024 = vmatprep.subr.bf16.mxu0 %v3885_v20  ;;  %2196 = vmatprep.subr.bf16.mxu1 %v3887_v21  ;;  %v3932_v56 = vld [vmem:[#allocation6 + $0x188] ss:$16 sps:$4 sm:$0xff]   ;;  %v431_v57 = vpack.c.bf16 %v423_v54, %v415_v53  ;;  %v3933_v58 = vld [vmem:[#allocation6 + $0x1a4] ss:$16 sps:$4 sm:$0xff]   ;;  %v3935_v59 = vld [vmem:[#allocation6 + $0x1ac] ss:$16 sps:$4 sm:$0xff]  }
  0xb6   : > { %2046 = vmatprep.mubr.bf16.mxu0 %v432_v50  ;;  %2218 = vmatprep.mubr.bf16.mxu1 %v432_v50  ;;  %v3937_v60 = vld [vmem:[#allocation6 + $0x1a0] ss:$16 sps:$4 sm:$0xff]   ;;  %v3938_v61 = vld [vmem:[#allocation6 + $0x1a8] ss:$16 sps:$4 sm:$0xff]   ;;  %v3939_v62 = vld [vmem:[#allocation6 + $0x1c4] ss:$16 sps:$4 sm:$0xff]  }
  0xb7   : > { %v3941_v63 = vld [vmem:[#allocation6 + $0x1cc] ss:$16 sps:$4 sm:$0xff]   ;;  %v3943_v0 = vld [vmem:[#allocation6 + $0x1c0] ss:$16 sps:$4 sm:$0xff]   ;;  %v3944_v1 = vld [vmem:[#allocation6 + $0x1c8] ss:$16 sps:$4 sm:$0xff]  }
  0xb8   : > { %2025 = vmatpush1.bf16.msra.mxu0 %v3889_v22  ;;  %2197 = vmatpush1.bf16.msra.mxu1 %v3890_v23  ;;  %v3945_v2 = vld [vmem:[#allocation6 + $0x1e4] ss:$16 sps:$4 sm:$0xff]   ;;  %v3947_v3 = vld [vmem:[#allocation6 + $0x1ec] ss:$16 sps:$4 sm:$0xff]   ;;  %v3949_v4 = vld [vmem:[#allocation6 + $0x1e0] ss:$16 sps:$4 sm:$0xff]  }
  0xb9   : > { %2026 = vmatprep.subr.bf16.mxu0 %v3891_v24  ;;  %2198 = vmatprep.subr.bf16.mxu1 %v3893_v25  ;;  %v3950_v5 = vld [vmem:[#allocation6 + $0x1e8] ss:$16 sps:$4 sm:$0xff]   ;;  %v3953_v6 = vld [vmem:[#allocation6 + $0x204] ss:$16 sps:$4 sm:$0xff]   ;;  %v3956_v7 = vld [vmem:[#allocation6 + $0x20c] ss:$16 sps:$4 sm:$0xff]  }
  0xba   : > { %v3951_v8 = vld [vmem:[#allocation6 + $0x200] ss:$16 sps:$4 sm:$0xff]   ;;  %v3954_v9 = vld [vmem:[#allocation6 + $0x208] ss:$16 sps:$4 sm:$0xff]   ;;  %v3959_v10 = vld [vmem:[#allocation6 + $0x224] ss:$16 sps:$4 sm:$0xff]  }
  0xbb   : > { %v3962_v11 = vld [vmem:[#allocation6 + $0x22c] ss:$16 sps:$4 sm:$0xff]   ;;  %v3957_v12 = vld [vmem:[#allocation6 + $0x220] ss:$16 sps:$4 sm:$0xff]   ;;  %v3960_v13 = vld [vmem:[#allocation6 + $0x228] ss:$16 sps:$4 sm:$0xff]  }
  0xbc   : > { %2027 = vmatpush1.bf16.msra.mxu0 %v3895_v26  ;;  %2199 = vmatpush1.bf16.msra.mxu1 %v3896_v27  ;;  %v3965_v14 = vld [vmem:[#allocation6 + $0x244] ss:$16 sps:$4 sm:$0xff]   ;;  %v3968_v15 = vld [vmem:[#allocation6 + $0x24c] ss:$16 sps:$4 sm:$0xff]   ;;  %v3963_v16 = vld [vmem:[#allocation6 + $0x240] ss:$16 sps:$4 sm:$0xff]  }
  0xbd   : > { %2028 = vmatprep.subr.bf16.mxu0 %v3897_v28  ;;  %2200 = vmatprep.subr.bf16.mxu1 %v3899_v29  ;;  %v3966_v17 = vld [vmem:[#allocation6 + $0x248] ss:$16 sps:$4 sm:$0xff]   ;;  %v3971_v18 = vld [vmem:[#allocation6 + $0x264] ss:$16 sps:$4 sm:$0xff]   ;;  %v3974_v19 = vld [vmem:[#allocation6 + $0x26c] ss:$16 sps:$4 sm:$0xff]  }
  0xbe   : > { %v3969_v20 = vld [vmem:[#allocation6 + $0x260] ss:$16 sps:$4 sm:$0xff]   ;;  %v3972_v21 = vld [vmem:[#allocation6 + $0x268] ss:$16 sps:$4 sm:$0xff]   ;;  %v3977_v22 = vld [vmem:[#allocation6 + $0x284] ss:$16 sps:$4 sm:$0xff]  }
  0xbf   : > { %v3980_v23 = vld [vmem:[#allocation6 + $0x28c] ss:$16 sps:$4 sm:$0xff]   ;;  %v3975_v24 = vld [vmem:[#allocation6 + $0x280] ss:$16 sps:$4 sm:$0xff]   ;;  %v3978_v25 = vld [vmem:[#allocation6 + $0x288] ss:$16 sps:$4 sm:$0xff]  }
  0xc0   : > { %2029 = vmatpush1.bf16.msra.mxu0 %v3901_v30  ;;  %2201 = vmatpush1.bf16.msra.mxu1 %v3902_v31  ;;  %v3983_v26 = vld [vmem:[#allocation6 + $0x2a4] ss:$16 sps:$4 sm:$0xff]   ;;  %v3986_v27 = vld [vmem:[#allocation6 + $0x2ac] ss:$16 sps:$4 sm:$0xff]   ;;  %v3981_v28 = vld [vmem:[#allocation6 + $0x2a0] ss:$16 sps:$4 sm:$0xff]  }
  0xc1   : > { %2030 = vmatprep.subr.bf16.mxu0 %v3903_v32  ;;  %2202 = vmatprep.subr.bf16.mxu1 %v3905_v33  ;;  %v3984_v29 = vld [vmem:[#allocation6 + $0x2a8] ss:$16 sps:$4 sm:$0xff]   ;;  %v3989_v30 = vld [vmem:[#allocation6 + $0x2c4] ss:$16 sps:$4 sm:$0xff]   ;;  %v3992_v31 = vld [vmem:[#allocation6 + $0x2cc] ss:$16 sps:$4 sm:$0xff]  }
  0xc2   : > { %v418_v32 = vld [vmem:[%s4864_s29 + $0x18] sm:$0xff]  ;;  %v3999_v46 = vld [vmem:[#allocation6 + $0x300] ss:$16 sps:$4 sm:$0xff]   ;;  %s3173_s20 = sshll.u32 %s409_s14, 4  ;;  %s3160_s17 = scalar_lea.sflag [#allocation5], %s4860_s27  ;;  %s4937_s20 = int_to_ptr.vmem [resolvable:$true] %s3173_s20 }
  0xc3   : > { %v426_v33 = vld [vmem:[%s4864_s29 + $0x58] sm:$0xff]  ;;  %v4005_v50 = vld [vmem:[#allocation6 + $0x320] ss:$16 sps:$4 sm:$0xff]   ;;  %s4501_s23 = scalar_lea.vmem %s4937_s20, 128  ;;  %s4592_s13 = smov [#allocation12]  }
  0xc4   : > { %2031 = vmatpush1.bf16.msra.mxu0 %v3907_v34  ;;  %2203 = vmatpush1.bf16.msra.mxu1 %v3908_v35  ;;  %v3987_v34 = vld [vmem:[#allocation6 + $0x2c0] ss:$16 sps:$4 sm:$0xff]   ;;  %v3990_v35 = vld [vmem:[#allocation6 + $0x2c8] ss:$16 sps:$4 sm:$0xff]   ;;  %v4016_v53 = vld [vmem:[#allocation6 + $0x34c] ss:$16 sps:$4 sm:$0xff]   ;;  %p4502_p3 = scmp.ne.s32.totalorder %s4937_s20, %s4501_s23 }
  0xc5   : > { %2032 = vmatprep.subr.bf16.mxu0 %v3909_v36  ;;  %2204 = vmatprep.subr.bf16.mxu1 %v3911_v37  ;;  %v434_v36 = vpack.c.bf16 %v426_v33, %v418_v32  ;;  %v3995_v37 = vld [vmem:[#allocation6 + $0x2e4] ss:$16 sps:$4 sm:$0xff]   ;;  %v4002_v47 = vld [vmem:[#allocation6 + $0x308] ss:$16 sps:$4 sm:$0xff]   ;;  %v4011_v54 = vld [vmem:[#allocation6 + $0x340] ss:$16 sps:$4 sm:$0xff]  }
  0xc6   : > { %v4070_v32 = vld [vmem:[#allocation6 + $0x46c] ss:$16 sps:$4 sm:$0xff]   ;;  %v4065_v33 = vld [vmem:[#allocation6 + $0x460] ss:$16 sps:$4 sm:$0xff]   ;;  %p4503_p5 = pnand %p4502_p3, %p4807_p10  ;;  %s4505_s22 = sshll.u32 %s4592_s13, 4  ;;  %s4506_s22 = int_to_ptr.vmem [resolvable:$false] %s4505_s22 }
  0xc7   : > { %s4507_s21 = scalar_lea.vmem %s4506_s22, 256  ;;  %p4508_p12 = scmp.lt.s32.totalorder %s4937_s20, %s4506_s22 }
  0xc8   : > { %2033 = vmatpush1.bf16.msra.mxu0 %v3913_v38  ;;  %2205 = vmatpush1.bf16.msra.mxu1 %v3914_v39  ;;  %v3998_v38 = vld [vmem:[#allocation6 + $0x2ec] ss:$16 sps:$4 sm:$0xff]   ;;  %v417_v39 = vld [vmem:[%s4864_s29 + $0x10] sm:$0xff]  ;;  %p4504_p7 = pneg %p4503_p5  ;;  %p4509_p2 = scmp.lt.s32.totalorder %s4507_s21, %s4501_s23 }
  0xc9   : > { %2034 = vmatprep.subr.bf16.mxu0 %v3915_v40  ;;  %2206 = vmatprep.subr.bf16.mxu1 %v3917_v41  ;;  %v425_v40 = vld [vmem:[%s4864_s29 + $0x50] sm:$0xff] }
  0xca   : > { %v3993_v41 = vld [vmem:[#allocation6 + $0x2e0] ss:$16 sps:$4 sm:$0xff]   ;;  %p4510_p1 = por %p4509_p2, %p4508_p12 }
  0xcc   : > { %2035 = vmatpush1.bf16.msra.mxu0 %v3919_v42  ;;  %2207 = vmatpush1.bf16.msra.mxu1 %v3920_v43  ;;  %v3996_v42 = vld [vmem:[#allocation6 + $0x2e8] ss:$16 sps:$4 sm:$0xff]   ;;  %v4886_v43 = vpack.c.bf16 %v425_v40, %v417_v39  ;;  %v4079_v39 = vld [vmem:[#allocation6 + $0x4a4] ss:$16 sps:$4 sm:$0xff]   ;;  %v4082_v40 = vld [vmem:[#allocation6 + $0x4ac] ss:$16 sps:$4 sm:$0xff]   ;;  %p4511_p13 = pnand %p4510_p1, %p4504_p7 }
  0xcd   : > { %2036 = vmatprep.subr.bf16.mxu0 %v3921_v44  ;;  %2208 = vmatprep.subr.bf16.mxu1 %v3923_v45  ;;  %v4001_v44 = vld [vmem:[#allocation6 + $0x304] ss:$16 sps:$4 sm:$0xff]   ;;  %v4004_v45 = vld [vmem:[#allocation6 + $0x30c] ss:$16 sps:$4 sm:$0xff]  }
  0xd0   : > { %2037 = vmatpush1.bf16.msra.mxu0 %v3925_v48  ;;  %2209 = vmatpush1.bf16.msra.mxu1 %v3926_v49  ;;  %v4007_v48 = vld [vmem:[#allocation6 + $0x324] ss:$16 sps:$4 sm:$0xff]   ;;  %v4010_v49 = vld [vmem:[#allocation6 + $0x32c] ss:$16 sps:$4 sm:$0xff]  }
  0xd1   : > { %2038 = vmatprep.subr.bf16.mxu0 %v3927_v51  ;;  %2210 = vmatprep.subr.bf16.mxu1 %v3929_v52  ;;  %v4008_v51 = vld [vmem:[#allocation6 + $0x328] ss:$16 sps:$4 sm:$0xff]   ;;  %v4013_v52 = vld [vmem:[#allocation6 + $0x344] ss:$16 sps:$4 sm:$0xff]  }
  0xd4   : > { %2039 = vmatpush1.bf16.msra.mxu0 %v3931_v55  ;;  %2211 = vmatpush1.bf16.msra.mxu1 %v3932_v56  ;;  %v4014_v55 = vld [vmem:[#allocation6 + $0x348] ss:$16 sps:$4 sm:$0xff]   ;;  %v4019_v56 = vld [vmem:[#allocation6 + $0x364] ss:$16 sps:$4 sm:$0xff]  }
  0xd5   : > { %2040 = vmatprep.subr.bf16.mxu0 %v3933_v58  ;;  %2212 = vmatprep.subr.bf16.mxu1 %v3935_v59  ;;  %v4017_v58 = vld [vmem:[#allocation6 + $0x360] ss:$16 sps:$4 sm:$0xff]   ;;  %v4020_v59 = vld [vmem:[#allocation6 + $0x368] ss:$16 sps:$4 sm:$0xff]  }
  0xd8   : > { %2041 = vmatpush1.bf16.msra.mxu0 %v3937_v60  ;;  %2213 = vmatpush1.bf16.msra.mxu1 %v3938_v61  ;;  %v4025_v60 = vld [vmem:[#allocation6 + $0x384] ss:$16 sps:$4 sm:$0xff]   ;;  %v4028_v61 = vld [vmem:[#allocation6 + $0x38c] ss:$16 sps:$4 sm:$0xff]  }
  0xd9   : > { %2042 = vmatprep.subr.bf16.mxu0 %v3939_v62  ;;  %2214 = vmatprep.subr.bf16.mxu1 %v3941_v63  ;;  %v4023_v62 = vld [vmem:[#allocation6 + $0x380] ss:$16 sps:$4 sm:$0xff]   ;;  %v4026_v63 = vld [vmem:[#allocation6 + $0x388] ss:$16 sps:$4 sm:$0xff]  }
  0xdc   : > { %2043 = vmatpush1.bf16.msra.mxu0 %v3943_v0  ;;  %2215 = vmatpush1.bf16.msra.mxu1 %v3944_v1  ;;  %v4031_v0 = vld [vmem:[#allocation6 + $0x3a4] ss:$16 sps:$4 sm:$0xff]   ;;  %v4034_v1 = vld [vmem:[#allocation6 + $0x3ac] ss:$16 sps:$4 sm:$0xff]  }
  0xdd   : > { %2044 = vmatprep.subr.bf16.mxu0 %v3945_v2  ;;  %2216 = vmatprep.subr.bf16.mxu1 %v3947_v3  ;;  %v4029_v2 = vld [vmem:[#allocation6 + $0x3a0] ss:$16 sps:$4 sm:$0xff]   ;;  %v4032_v3 = vld [vmem:[#allocation6 + $0x3a8] ss:$16 sps:$4 sm:$0xff]  }
  0xe0   : > { %2045 = vmatpush1.bf16.msra.mxu0 %v3949_v4  ;;  %2217 = vmatpush1.bf16.msra.mxu1 %v3950_v5  ;;  %v4037_v4 = vld [vmem:[#allocation6 + $0x3c4] ss:$16 sps:$4 sm:$0xff]   ;;  %v4040_v5 = vld [vmem:[#allocation6 + $0x3cc] ss:$16 sps:$4 sm:$0xff]  }
  0xe1   : > { %2057 = vmatprep.subr.bf16.mxu0 %v3953_v6  ;;  %2229 = vmatprep.subr.bf16.mxu1 %v3956_v7  ;;  %v4035_v6 = vld [vmem:[#allocation6 + $0x3c0] ss:$16 sps:$4 sm:$0xff]   ;;  %v4038_v7 = vld [vmem:[#allocation6 + $0x3c8] ss:$16 sps:$4 sm:$0xff]  }
  0xe3   : > { %2047 = vmatmul.mubr.bf16.vlgmr.msra.gmra.mrb[0].mxu0 %v431_v57  ;;  %2219 = vmatmul.mubr.bf16.vlgmr.msra.gmra.mrb[0].mxu1 %v431_v57  ;;  %v4022_v57 = vld [vmem:[#allocation6 + $0x36c] ss:$16 sps:$4 sm:$0xff]  }
  0xe4   : > { %2058 = vmatpush1.bf16.msra.mxu0 %v3951_v8  ;;  %2230 = vmatpush1.bf16.msra.mxu1 %v3954_v9  ;;  %v4043_v8 = vld [vmem:[#allocation6 + $0x3e4] ss:$16 sps:$4 sm:$0xff]   ;;  %v4046_v9 = vld [vmem:[#allocation6 + $0x3ec] ss:$16 sps:$4 sm:$0xff]  }
  0xe5   : > { %2059 = vmatprep.subr.bf16.mxu0 %v3959_v10  ;;  %2231 = vmatprep.subr.bf16.mxu1 %v3962_v11  ;;  %v4589_v10 = vmov 0   ;;  %v4041_v11 = vld [vmem:[#allocation6 + $0x3e0] ss:$16 sps:$4 sm:$0xff]  }
  0xe6   : > { %2089 = vmatprep.mubr.bf16.mxu0 %v434_v36  ;;  %2261 = vmatprep.mubr.bf16.mxu1 %v434_v36  ;;  %414 = vst.msk [vmem:[#allocation2 + $0x38] sm:$0xff] %vm413_vm0, %v4589_v10  ;;  %v4076_v36 = vld [vmem:[#allocation6 + $0x48c] ss:$16 sps:$4 sm:$0xff]   ;;  %v429_v10 = vld [vmem:[%s4864_s29 + $0x70] sm:$0xff] }
  0xe8   : > { %2060 = vmatpush1.bf16.msra.mxu0 %v3957_v12  ;;  %2232 = vmatpush1.bf16.msra.mxu1 %v3960_v13  ;;  %v4044_v12 = vld [vmem:[#allocation6 + $0x3e8] ss:$16 sps:$4 sm:$0xff]   ;;  %v4049_v13 = vld [vmem:[#allocation6 + $0x404] ss:$16 sps:$4 sm:$0xff]  }
  0xe9   : > { %2061 = vmatprep.subr.bf16.mxu0 %v3965_v14  ;;  %2233 = vmatprep.subr.bf16.mxu1 %v3968_v15  ;;  %v4052_v14 = vld [vmem:[#allocation6 + $0x40c] ss:$16 sps:$4 sm:$0xff]   ;;  %v4047_v15 = vld [vmem:[#allocation6 + $0x400] ss:$16 sps:$4 sm:$0xff]  }
  0xec   : > { %2062 = vmatpush1.bf16.msra.mxu0 %v3963_v16  ;;  %2234 = vmatpush1.bf16.msra.mxu1 %v3966_v17  ;;  %v4050_v16 = vld [vmem:[#allocation6 + $0x408] ss:$16 sps:$4 sm:$0xff]   ;;  %v4055_v17 = vld [vmem:[#allocation6 + $0x424] ss:$16 sps:$4 sm:$0xff]  }
  0xed   : > { %2063 = vmatprep.subr.bf16.mxu0 %v3971_v18  ;;  %2235 = vmatprep.subr.bf16.mxu1 %v3974_v19  ;;  %v4058_v18 = vld [vmem:[#allocation6 + $0x42c] ss:$16 sps:$4 sm:$0xff]  }
  0xee   : > { %v420_v19 = vld [vmem:[%s4864_s29 + $0x28] sm:$0xff] }
  0xf0   : > { %2064 = vmatpush1.bf16.msra.mxu0 %v3969_v20  ;;  %2236 = vmatpush1.bf16.msra.mxu1 %v3972_v21  ;;  %v428_v20 = vld [vmem:[%s4864_s29 + $0x68] sm:$0xff]  ;;  %v4053_v21 = vld [vmem:[#allocation6 + $0x420] ss:$16 sps:$4 sm:$0xff]  }
  0xf1   : > { %2065 = vmatprep.subr.bf16.mxu0 %v3977_v22  ;;  %2237 = vmatprep.subr.bf16.mxu1 %v3980_v23  ;;  %v4056_v22 = vld [vmem:[#allocation6 + $0x428] ss:$16 sps:$4 sm:$0xff]   ;;  %v436_v23 = vpack.c.bf16 %v428_v20, %v420_v19  ;;  %v4131_v19 = vld [vmem:[#allocation6 + $0x5c0] ss:$16 sps:$4 sm:$0xff]  }
  0xf2   : > { %v4134_v20 = vld [vmem:[#allocation6 + $0x5c8] ss:$16 sps:$4 sm:$0xff]  }
  0xf4   : > { %2066 = vmatpush1.bf16.msra.mxu0 %v3975_v24  ;;  %2238 = vmatpush1.bf16.msra.mxu1 %v3978_v25  ;;  %v4061_v24 = vld [vmem:[#allocation6 + $0x444] ss:$16 sps:$4 sm:$0xff]   ;;  %v4064_v25 = vld [vmem:[#allocation6 + $0x44c] ss:$16 sps:$4 sm:$0xff]  }
  0xf5   : > { %2067 = vmatprep.subr.bf16.mxu0 %v3983_v26  ;;  %2239 = vmatprep.subr.bf16.mxu1 %v3986_v27  ;;  %v419_v26 = vld [vmem:[%s4864_s29 + $0x20] sm:$0xff] }
  0xf6   : > { %v427_v27 = vld [vmem:[%s4864_s29 + $0x60] sm:$0xff] }
  0xf8   : > { %2068 = vmatpush1.bf16.msra.mxu0 %v3981_v28  ;;  %2240 = vmatpush1.bf16.msra.mxu1 %v3984_v29  ;;  %v4059_v28 = vld [vmem:[#allocation6 + $0x440] ss:$16 sps:$4 sm:$0xff]   ;;  %v4062_v29 = vld [vmem:[#allocation6 + $0x448] ss:$16 sps:$4 sm:$0xff]  }
  0xf9   : > { %2069 = vmatprep.subr.bf16.mxu0 %v3989_v30  ;;  %2241 = vmatprep.subr.bf16.mxu1 %v3992_v31  ;;  %v4894_v30 = vpack.c.bf16 %v427_v27, %v419_v26  ;;  %v4067_v31 = vld [vmem:[#allocation6 + $0x464] ss:$16 sps:$4 sm:$0xff]   ;;  %v4148_v26 = vld [vmem:[#allocation6 + $0x60c] ss:$16 sps:$4 sm:$0xff]   ;;  %v4143_v27 = vld [vmem:[#allocation6 + $0x600] ss:$16 sps:$4 sm:$0xff]  }
  0xfc   : > { %2070 = vmatpush1.bf16.msra.mxu0 %v3987_v34  ;;  %2242 = vmatpush1.bf16.msra.mxu1 %v3990_v35  ;;  %v4068_v34 = vld [vmem:[#allocation6 + $0x468] ss:$16 sps:$4 sm:$0xff]   ;;  %v4073_v35 = vld [vmem:[#allocation6 + $0x484] ss:$16 sps:$4 sm:$0xff]  }
  0xfd   : > { %2071 = vmatprep.subr.bf16.mxu0 %v3995_v37  ;;  %2243 = vmatprep.subr.bf16.mxu1 %v3998_v38  ;;  %v4071_v37 = vld [vmem:[#allocation6 + $0x480] ss:$16 sps:$4 sm:$0xff]   ;;  %v4074_v38 = vld [vmem:[#allocation6 + $0x488] ss:$16 sps:$4 sm:$0xff]  }
 0x100   : > { %2072 = vmatpush1.bf16.msra.mxu0 %v3993_v41  ;;  %2244 = vmatpush1.bf16.msra.mxu1 %v3996_v42  ;;  %v4077_v41 = vld [vmem:[#allocation6 + $0x4a0] ss:$16 sps:$4 sm:$0xff]   ;;  %v4080_v42 = vld [vmem:[#allocation6 + $0x4a8] ss:$16 sps:$4 sm:$0xff]  }
 0x101   : > { %2073 = vmatprep.subr.bf16.mxu0 %v4001_v44  ;;  %2245 = vmatprep.subr.bf16.mxu1 %v4004_v45  ;;  %v4088_v44 = vld [vmem:[#allocation6 + $0x4cc] ss:$16 sps:$4 sm:$0xff]   ;;  %v4083_v45 = vld [vmem:[#allocation6 + $0x4c0] ss:$16 sps:$4 sm:$0xff]  }
 0x104   : > { %2074 = vmatpush1.bf16.msra.mxu0 %v3999_v46  ;;  %2246 = vmatpush1.bf16.msra.mxu1 %v4002_v47  ;;  %v4086_v46 = vld [vmem:[#allocation6 + $0x4c8] ss:$16 sps:$4 sm:$0xff]   ;;  %v4091_v47 = vld [vmem:[#allocation6 + $0x4e4] ss:$16 sps:$4 sm:$0xff]  }
 0x105   : > { %2075 = vmatprep.subr.bf16.mxu0 %v4007_v48  ;;  %2247 = vmatprep.subr.bf16.mxu1 %v4010_v49  ;;  %v4094_v48 = vld [vmem:[#allocation6 + $0x4ec] ss:$16 sps:$4 sm:$0xff]   ;;  %v4089_v49 = vld [vmem:[#allocation6 + $0x4e0] ss:$16 sps:$4 sm:$0xff]  }
 0x108   : > { %2076 = vmatpush1.bf16.msra.mxu0 %v4005_v50  ;;  %2248 = vmatpush1.bf16.msra.mxu1 %v4008_v51  ;;  %v4092_v50 = vld [vmem:[#allocation6 + $0x4e8] ss:$16 sps:$4 sm:$0xff]   ;;  %v4097_v51 = vld [vmem:[#allocation6 + $0x504] ss:$16 sps:$4 sm:$0xff]  }
 0x109   : > { %2077 = vmatprep.subr.bf16.mxu0 %v4013_v52  ;;  %2249 = vmatprep.subr.bf16.mxu1 %v4016_v53  ;;  %v4100_v52 = vld [vmem:[#allocation6 + $0x50c] ss:$16 sps:$4 sm:$0xff]   ;;  %v4095_v53 = vld [vmem:[#allocation6 + $0x500] ss:$16 sps:$4 sm:$0xff]  }
 0x10c   : > { %2078 = vmatpush1.bf16.msra.mxu0 %v4011_v54  ;;  %2250 = vmatpush1.bf16.msra.mxu1 %v4014_v55  ;;  %v4098_v54 = vld [vmem:[#allocation6 + $0x508] ss:$16 sps:$4 sm:$0xff]   ;;  %v4103_v55 = vld [vmem:[#allocation6 + $0x524] ss:$16 sps:$4 sm:$0xff]  }
 0x10d   : > { %2079 = vmatprep.subr.bf16.mxu0 %v4019_v56  ;;  %2251 = vmatprep.subr.bf16.mxu1 %v4022_v57  ;;  %v4106_v56 = vld [vmem:[#allocation6 + $0x52c] ss:$16 sps:$4 sm:$0xff]   ;;  %v4101_v57 = vld [vmem:[#allocation6 + $0x520] ss:$16 sps:$4 sm:$0xff]  }
 0x110   : > { %2080 = vmatpush1.bf16.msra.mxu0 %v4017_v58  ;;  %2252 = vmatpush1.bf16.msra.mxu1 %v4020_v59  ;;  %v4104_v58 = vld [vmem:[#allocation6 + $0x528] ss:$16 sps:$4 sm:$0xff]   ;;  %v4109_v59 = vld [vmem:[#allocation6 + $0x544] ss:$16 sps:$4 sm:$0xff]  }
 0x111   : > { %2081 = vmatprep.subr.bf16.mxu0 %v4025_v60  ;;  %2253 = vmatprep.subr.bf16.mxu1 %v4028_v61  ;;  %v4112_v60 = vld [vmem:[#allocation6 + $0x54c] ss:$16 sps:$4 sm:$0xff]   ;;  %v4107_v61 = vld [vmem:[#allocation6 + $0x540] ss:$16 sps:$4 sm:$0xff]  }
 0x114   : > { %2082 = vmatpush1.bf16.msra.mxu0 %v4023_v62  ;;  %2254 = vmatpush1.bf16.msra.mxu1 %v4026_v63  ;;  %v4110_v62 = vld [vmem:[#allocation6 + $0x548] ss:$16 sps:$4 sm:$0xff]   ;;  %v4115_v63 = vld [vmem:[#allocation6 + $0x564] ss:$16 sps:$4 sm:$0xff]  }
 0x115   : > { %2083 = vmatprep.subr.bf16.mxu0 %v4031_v0  ;;  %2255 = vmatprep.subr.bf16.mxu1 %v4034_v1  ;;  %v4118_v0 = vld [vmem:[#allocation6 + $0x56c] ss:$16 sps:$4 sm:$0xff]   ;;  %v4113_v1 = vld [vmem:[#allocation6 + $0x560] ss:$16 sps:$4 sm:$0xff]  }
 0x118   : > { %2084 = vmatpush1.bf16.msra.mxu0 %v4029_v2  ;;  %2256 = vmatpush1.bf16.msra.mxu1 %v4032_v3  ;;  %v4116_v2 = vld [vmem:[#allocation6 + $0x568] ss:$16 sps:$4 sm:$0xff]   ;;  %v4121_v3 = vld [vmem:[#allocation6 + $0x584] ss:$16 sps:$4 sm:$0xff]  }
 0x119   : > { %2085 = vmatprep.subr.bf16.mxu0 %v4037_v4  ;;  %2257 = vmatprep.subr.bf16.mxu1 %v4040_v5  ;;  %v4124_v4 = vld [vmem:[#allocation6 + $0x58c] ss:$16 sps:$4 sm:$0xff]   ;;  %v4119_v5 = vld [vmem:[#allocation6 + $0x580] ss:$16 sps:$4 sm:$0xff]  }
 0x11c   : > { %2086 = vmatpush1.bf16.msra.mxu0 %v4035_v6  ;;  %2258 = vmatpush1.bf16.msra.mxu1 %v4038_v7  ;;  %v4122_v6 = vld [vmem:[#allocation6 + $0x588] ss:$16 sps:$4 sm:$0xff]  }
 0x11d   : > { %2087 = vmatprep.subr.bf16.mxu0 %v4043_v8  ;;  %2259 = vmatprep.subr.bf16.mxu1 %v4046_v9  ;;  %v422_v7 = vld [vmem:[%s4864_s29 + $0x38] sm:$0xff]  ;;  %v421_v9 = vld [vmem:[%s4864_s29 + $0x30] sm:$0xff] }
 0x11e   : > { %v430_v8 = vld [vmem:[%s4864_s29 + $0x78] sm:$0xff] }
 0x120   : > { %2088 = vmatpush1.bf16.msra.mxu0 %v4041_v11  ;;  %2260 = vmatpush1.bf16.msra.mxu1 %v4044_v12  ;;  %v4127_v11 = vld [vmem:[#allocation6 + $0x5a4] ss:$16 sps:$4 sm:$0xff]   ;;  %v438_v12 = vpack.c.bf16 %v430_v8, %v422_v7  ;;  %v4214_v7 = vld [vmem:[#allocation6 + $0x76c] ss:$16 sps:$4 sm:$0xff]   ;;  %v4209_v8 = vld [vmem:[#allocation6 + $0x760] ss:$16 sps:$4 sm:$0xff]  }
 0x121   : > { %2100 = vmatprep.subr.bf16.mxu0 %v4049_v13  ;;  %2272 = vmatprep.subr.bf16.mxu1 %v4052_v14  ;;  %v4900_v13 = vpack.c.bf16 %v429_v10, %v421_v9  ;;  %v4130_v14 = vld [vmem:[#allocation6 + $0x5ac] ss:$16 sps:$4 sm:$0xff]   ;;  %v4212_v9 = vld [vmem:[#allocation6 + $0x768] ss:$16 sps:$4 sm:$0xff]   ;;  %v4217_v10 = vld [vmem:[#allocation6 + $0x784] ss:$16 sps:$4 sm:$0xff]  }
 0x122   : > { %447 = vst.msk [vmem:[#allocation2 + $0x38] sm:$0xff] %vm446_vm1, %v438_v12  ;;  %v4215_v12 = vld [vmem:[#allocation6 + $0x780] ss:$16 sps:$4 sm:$0xff]  }
 0x123   : > { %2090 = vmatmul.mubr.bf16.vlgmr.msra.gmra.mrb[0].mxu0 %v4886_v43  ;;  %2262 = vmatmul.mubr.bf16.vlgmr.msra.gmra.mrb[0].mxu1 %v4886_v43  ;;  %v4085_v43 = vld [vmem:[#allocation6 + $0x4c4] ss:$16 sps:$4 sm:$0xff]  }
 0x124   : > { %2101 = vmatpush1.bf16.msra.mxu0 %v4047_v15  ;;  %2273 = vmatpush1.bf16.msra.mxu1 %v4050_v16  ;;  %v4125_v15 = vld [vmem:[#allocation6 + $0x5a0] ss:$16 sps:$4 sm:$0xff]   ;;  %v4128_v16 = vld [vmem:[#allocation6 + $0x5a8] ss:$16 sps:$4 sm:$0xff]  }
 0x125   : > { %2102 = vmatprep.subr.bf16.mxu0 %v4055_v17  ;;  %2274 = vmatprep.subr.bf16.mxu1 %v4058_v18  ;;  %v4133_v17 = vld [vmem:[#allocation6 + $0x5c4] ss:$16 sps:$4 sm:$0xff]   ;;  %v4136_v18 = vld [vmem:[#allocation6 + $0x5cc] ss:$16 sps:$4 sm:$0xff]  }
 0x126   : > { %2132 = vmatprep.mubr.bf16.mxu0 %v436_v23  ;;  %2304 = vmatprep.mubr.bf16.mxu1 %v436_v23  ;;  %v4137_v23 = vld [vmem:[#allocation6 + $0x5e0] ss:$16 sps:$4 sm:$0xff]  }
 0x128   : > { %2103 = vmatpush1.bf16.msra.mxu0 %v4053_v21  ;;  %2275 = vmatpush1.bf16.msra.mxu1 %v4056_v22  ;;  %v4139_v21 = vld [vmem:[#allocation6 + $0x5e4] ss:$16 sps:$4 sm:$0xff]   ;;  %v4142_v22 = vld [vmem:[#allocation6 + $0x5ec] ss:$16 sps:$4 sm:$0xff]  }
 0x129   : > { %2104 = vmatprep.subr.bf16.mxu0 %v4061_v24  ;;  %2276 = vmatprep.subr.bf16.mxu1 %v4064_v25  ;;  %v4140_v24 = vld [vmem:[#allocation6 + $0x5e8] ss:$16 sps:$4 sm:$0xff]   ;;  %v4145_v25 = vld [vmem:[#allocation6 + $0x604] ss:$16 sps:$4 sm:$0xff]  }
 0x12c   : > { %2105 = vmatpush1.bf16.msra.mxu0 %v4059_v28  ;;  %2277 = vmatpush1.bf16.msra.mxu1 %v4062_v29  ;;  %v4146_v28 = vld [vmem:[#allocation6 + $0x608] ss:$16 sps:$4 sm:$0xff]   ;;  %v4151_v29 = vld [vmem:[#allocation6 + $0x624] ss:$16 sps:$4 sm:$0xff]  }
 0x12d   : > { %2106 = vmatprep.subr.bf16.mxu0 %v4067_v31  ;;  %2278 = vmatprep.subr.bf16.mxu1 %v4070_v32  ;;  %v4154_v31 = vld [vmem:[#allocation6 + $0x62c] ss:$16 sps:$4 sm:$0xff]   ;;  %v4149_v32 = vld [vmem:[#allocation6 + $0x620] ss:$16 sps:$4 sm:$0xff]  }
 0x130   : > { %2107 = vmatpush1.bf16.msra.mxu0 %v4065_v33  ;;  %2279 = vmatpush1.bf16.msra.mxu1 %v4068_v34  ;;  %v4152_v33 = vld [vmem:[#allocation6 + $0x628] ss:$16 sps:$4 sm:$0xff]   ;;  %v4157_v34 = vld [vmem:[#allocation6 + $0x644] ss:$16 sps:$4 sm:$0xff]  }
 0x131   : > { %2108 = vmatprep.subr.bf16.mxu0 %v4073_v35  ;;  %2280 = vmatprep.subr.bf16.mxu1 %v4076_v36  ;;  %v4160_v35 = vld [vmem:[#allocation6 + $0x64c] ss:$16 sps:$4 sm:$0xff]  }
 0x132   : > { %v455_v36 = vld [vmem:[#allocation2 + $0x38] sm:$0xff] }
 0x134   : > { %2109 = vmatpush1.bf16.msra.mxu0 %v4071_v37  ;;  %2281 = vmatpush1.bf16.msra.mxu1 %v4074_v38  ;;  %v4155_v37 = vld [vmem:[#allocation6 + $0x640] ss:$16 sps:$4 sm:$0xff]   ;;  %v4158_v38 = vld [vmem:[#allocation6 + $0x648] ss:$16 sps:$4 sm:$0xff]  }
 0x135   : > { %2110 = vmatprep.subr.bf16.mxu0 %v4079_v39  ;;  %2282 = vmatprep.subr.bf16.mxu1 %v4082_v40  ;;  %v4163_v39 = vld [vmem:[#allocation6 + $0x664] ss:$16 sps:$4 sm:$0xff]   ;;  %v4166_v40 = vld [vmem:[#allocation6 + $0x66c] ss:$16 sps:$4 sm:$0xff]  }
 0x138   : > { %2111 = vmatpush1.bf16.msra.mxu0 %v4077_v41  ;;  %2283 = vmatpush1.bf16.msra.mxu1 %v4080_v42  ;;  %v4161_v41 = vld [vmem:[#allocation6 + $0x660] ss:$16 sps:$4 sm:$0xff]   ;;  %v4164_v42 = vld [vmem:[#allocation6 + $0x668] ss:$16 sps:$4 sm:$0xff]  }
 0x139   : > { %2112 = vmatprep.subr.bf16.mxu0 %v4085_v43  ;;  %2284 = vmatprep.subr.bf16.mxu1 %v4088_v44  ;;  %v4172_v43 = vld [vmem:[#allocation6 + $0x68c] ss:$16 sps:$4 sm:$0xff]   ;;  %v4167_v44 = vld [vmem:[#allocation6 + $0x680] ss:$16 sps:$4 sm:$0xff]  }
 0x13c   : > { %2113 = vmatpush1.bf16.msra.mxu0 %v4083_v45  ;;  %2285 = vmatpush1.bf16.msra.mxu1 %v4086_v46  ;;  %v4170_v45 = vld [vmem:[#allocation6 + $0x688] ss:$16 sps:$4 sm:$0xff]   ;;  %v4175_v46 = vld [vmem:[#allocation6 + $0x6a4] ss:$16 sps:$4 sm:$0xff]  }
 0x13d   : > { %2114 = vmatprep.subr.bf16.mxu0 %v4091_v47  ;;  %2286 = vmatprep.subr.bf16.mxu1 %v4094_v48  ;;  %v4178_v47 = vld [vmem:[#allocation6 + $0x6ac] ss:$16 sps:$4 sm:$0xff]   ;;  %v4173_v48 = vld [vmem:[#allocation6 + $0x6a0] ss:$16 sps:$4 sm:$0xff]  }
 0x140   : > { %2115 = vmatpush1.bf16.msra.mxu0 %v4089_v49  ;;  %2287 = vmatpush1.bf16.msra.mxu1 %v4092_v50  ;;  %v4176_v49 = vld [vmem:[#allocation6 + $0x6a8] ss:$16 sps:$4 sm:$0xff]   ;;  %v4181_v50 = vld [vmem:[#allocation6 + $0x6c4] ss:$16 sps:$4 sm:$0xff]  }
 0x141   : > { %2116 = vmatprep.subr.bf16.mxu0 %v4097_v51  ;;  %2288 = vmatprep.subr.bf16.mxu1 %v4100_v52  ;;  %v4184_v51 = vld [vmem:[#allocation6 + $0x6cc] ss:$16 sps:$4 sm:$0xff]   ;;  %v4179_v52 = vld [vmem:[#allocation6 + $0x6c0] ss:$16 sps:$4 sm:$0xff]  }
 0x144   : > { %2117 = vmatpush1.bf16.msra.mxu0 %v4095_v53  ;;  %2289 = vmatpush1.bf16.msra.mxu1 %v4098_v54  ;;  %v4182_v53 = vld [vmem:[#allocation6 + $0x6c8] ss:$16 sps:$4 sm:$0xff]   ;;  %v4187_v54 = vld [vmem:[#allocation6 + $0x6e4] ss:$16 sps:$4 sm:$0xff]  }
 0x145   : > { %2118 = vmatprep.subr.bf16.mxu0 %v4103_v55  ;;  %2290 = vmatprep.subr.bf16.mxu1 %v4106_v56  ;;  %v4190_v55 = vld [vmem:[#allocation6 + $0x6ec] ss:$16 sps:$4 sm:$0xff]   ;;  %v4185_v56 = vld [vmem:[#allocation6 + $0x6e0] ss:$16 sps:$4 sm:$0xff]  }
 0x148   : > { %2119 = vmatpush1.bf16.msra.mxu0 %v4101_v57  ;;  %2291 = vmatpush1.bf16.msra.mxu1 %v4104_v58  ;;  %v4188_v57 = vld [vmem:[#allocation6 + $0x6e8] ss:$16 sps:$4 sm:$0xff]   ;;  %v4193_v58 = vld [vmem:[#allocation6 + $0x704] ss:$16 sps:$4 sm:$0xff]  }
 0x149   : > { %2120 = vmatprep.subr.bf16.mxu0 %v4109_v59  ;;  %2292 = vmatprep.subr.bf16.mxu1 %v4112_v60  ;;  %v4196_v59 = vld [vmem:[#allocation6 + $0x70c] ss:$16 sps:$4 sm:$0xff]   ;;  %v4191_v60 = vld [vmem:[#allocation6 + $0x700] ss:$16 sps:$4 sm:$0xff]  }
 0x14c   : > { %2121 = vmatpush1.bf16.msra.mxu0 %v4107_v61  ;;  %2293 = vmatpush1.bf16.msra.mxu1 %v4110_v62  ;;  %v4194_v61 = vld [vmem:[#allocation6 + $0x708] ss:$16 sps:$4 sm:$0xff]   ;;  %v4199_v62 = vld [vmem:[#allocation6 + $0x724] ss:$16 sps:$4 sm:$0xff]  }
 0x14d   : > { %2122 = vmatprep.subr.bf16.mxu0 %v4115_v63  ;;  %2294 = vmatprep.subr.bf16.mxu1 %v4118_v0  ;;  %v4202_v63 = vld [vmem:[#allocation6 + $0x72c] ss:$16 sps:$4 sm:$0xff]   ;;  %v4197_v0 = vld [vmem:[#allocation6 + $0x720] ss:$16 sps:$4 sm:$0xff]  }
 0x150   : > { %2123 = vmatpush1.bf16.msra.mxu0 %v4113_v1  ;;  %2295 = vmatpush1.bf16.msra.mxu1 %v4116_v2  ;;  %v4200_v1 = vld [vmem:[#allocation6 + $0x728] ss:$16 sps:$4 sm:$0xff]   ;;  %v4205_v2 = vld [vmem:[#allocation6 + $0x744] ss:$16 sps:$4 sm:$0xff]  }
 0x151   : > { %2124 = vmatprep.subr.bf16.mxu0 %v4121_v3  ;;  %2296 = vmatprep.subr.bf16.mxu1 %v4124_v4  ;;  %v4208_v3 = vld [vmem:[#allocation6 + $0x74c] ss:$16 sps:$4 sm:$0xff]   ;;  %v4203_v4 = vld [vmem:[#allocation6 + $0x740] ss:$16 sps:$4 sm:$0xff]  }
 0x154   : > { %2125 = vmatpush1.bf16.msra.mxu0 %v4119_v5  ;;  %2297 = vmatpush1.bf16.msra.mxu1 %v4122_v6  ;;  %v4206_v5 = vld [vmem:[#allocation6 + $0x748] ss:$16 sps:$4 sm:$0xff]   ;;  %v4211_v6 = vld [vmem:[#allocation6 + $0x764] ss:$16 sps:$4 sm:$0xff]  }
 0x155   : > { %2126 = vmatprep.subr.bf16.mxu0 %v4127_v11  ;;  %2298 = vmatprep.subr.bf16.mxu1 %v4130_v14  ;;  %v4220_v11 = vld [vmem:[#allocation6 + $0x78c] ss:$16 sps:$4 sm:$0xff]   ;;  %v4218_v14 = vld [vmem:[#allocation6 + $0x788] ss:$16 sps:$4 sm:$0xff]  }
 0x158   : > { %2127 = vmatpush1.bf16.msra.mxu0 %v4125_v15  ;;  %2299 = vmatpush1.bf16.msra.mxu1 %v4128_v16  ;;  %v4223_v15 = vld [vmem:[#allocation6 + $0x7a4] ss:$16 sps:$4 sm:$0xff]   ;;  %v4226_v16 = vld [vmem:[#allocation6 + $0x7ac] ss:$16 sps:$4 sm:$0xff]  }
 0x159   : > { %2128 = vmatprep.subr.bf16.mxu0 %v4133_v17  ;;  %2300 = vmatprep.subr.bf16.mxu1 %v4136_v18  ;;  %v4221_v17 = vld [vmem:[#allocation6 + $0x7a0] ss:$16 sps:$4 sm:$0xff]   ;;  %v4224_v18 = vld [vmem:[#allocation6 + $0x7a8] ss:$16 sps:$4 sm:$0xff]  }
 0x15c   : > { %2129 = vmatpush1.bf16.msra.mxu0 %v4131_v19  ;;  %2301 = vmatpush1.bf16.msra.mxu1 %v4134_v20  ;;  %v4229_v19 = vld [vmem:[#allocation6 + $0x7c4] ss:$16 sps:$4 sm:$0xff]   ;;  %v4232_v20 = vld [vmem:[#allocation6 + $0x7cc] ss:$16 sps:$4 sm:$0xff]  }
 0x15d   : > { %2130 = vmatprep.subr.bf16.mxu0 %v4139_v21  ;;  %2302 = vmatprep.subr.bf16.mxu1 %v4142_v22  ;;  %v4227_v21 = vld [vmem:[#allocation6 + $0x7c0] ss:$16 sps:$4 sm:$0xff]   ;;  %v4230_v22 = vld [vmem:[#allocation6 + $0x7c8] ss:$16 sps:$4 sm:$0xff]  }
 0x160   : > { %2131 = vmatpush1.bf16.msra.mxu0 %v4137_v23  ;;  %2303 = vmatpush1.bf16.msra.mxu1 %v4140_v24  ;;  %v4235_v23 = vld [vmem:[#allocation6 + $0x7e4] ss:$16 sps:$4 sm:$0xff]   ;;  %v4238_v24 = vld [vmem:[#allocation6 + $0x7ec] ss:$16 sps:$4 sm:$0xff]  }
 0x161   : > { %2143 = vmatprep.subr.bf16.mxu0 %v4145_v25  ;;  %2315 = vmatprep.subr.bf16.mxu1 %v4148_v26  ;;  %v4233_v25 = vld [vmem:[#allocation6 + $0x7e0] ss:$16 sps:$4 sm:$0xff]   ;;  %v4236_v26 = vld [vmem:[#allocation6 + $0x7e8] ss:$16 sps:$4 sm:$0xff]  }
 0x163   : > { %2133 = vmatmul.mubr.bf16.vlgmr.msra.gmra.mrb[0].mxu0 %v4894_v30  ;;  %2305 = vmatmul.mubr.bf16.vlgmr.msra.gmra.mrb[0].mxu1 %v4894_v30  ;;  %v4169_v30 = vld [vmem:[#allocation6 + $0x684] ss:$16 sps:$4 sm:$0xff]  }
 0x164   : > { %2144 = vmatpush1.bf16.msra.mxu0 %v4143_v27  ;;  %2316 = vmatpush1.bf16.msra.mxu1 %v4146_v28  ;;  %v4241_v27 = vld [vmem:[#allocation8 + $0x4] ss:$8 sps:$4 sm:$0xff]   ;;  %v4239_v28 = vld [vmem:[#allocation8] ss:$8 sps:$4 sm:$0xff]  }
 0x165   : > { %2145 = vmatprep.subr.bf16.mxu0 %v4151_v29  ;;  %2317 = vmatprep.subr.bf16.mxu1 %v4154_v31  ;;  %v4244_v29 = vld [vmem:[#allocation8 + $0x14] ss:$8 sps:$4 sm:$0xff]   ;;  %v4242_v31 = vld [vmem:[#allocation8 + $0x10] ss:$8 sps:$4 sm:$0xff]  }
 0x166   : > { %2175 = vmatprep.mubr.bf16.mxu0 %v455_v36  ;;  %2347 = vmatprep.mubr.bf16.mxu1 %v455_v36  ;;  %v4253_v36 = vld [vmem:[#allocation8 + $0x44] ss:$8 sps:$4 sm:$0xff]  }
 0x168   : > { %2146 = vmatpush1.bf16.msra.mxu0 %v4149_v32  ;;  %2318 = vmatpush1.bf16.msra.mxu1 %v4152_v33  ;;  %v4247_v32 = vld [vmem:[#allocation8 + $0x24] ss:$8 sps:$4 sm:$0xff]   ;;  %v4245_v33 = vld [vmem:[#allocation8 + $0x20] ss:$8 sps:$4 sm:$0xff]  }
 0x169   : > { %2147 = vmatprep.subr.bf16.mxu0 %v4157_v34  ;;  %2319 = vmatprep.subr.bf16.mxu1 %v4160_v35  ;;  %v4250_v34 = vld [vmem:[#allocation8 + $0x34] ss:$8 sps:$4 sm:$0xff]   ;;  %v4248_v35 = vld [vmem:[#allocation8 + $0x30] ss:$8 sps:$4 sm:$0xff]  }
 0x16c   : > { %2148 = vmatpush1.bf16.msra.mxu0 %v4155_v37  ;;  %2320 = vmatpush1.bf16.msra.mxu1 %v4158_v38  ;;  %v4251_v37 = vld [vmem:[#allocation8 + $0x40] ss:$8 sps:$4 sm:$0xff]   ;;  %v4256_v38 = vld [vmem:[#allocation8 + $0x54] ss:$8 sps:$4 sm:$0xff]  }
 0x16d   : > { %2149 = vmatprep.subr.bf16.mxu0 %v4163_v39  ;;  %2321 = vmatprep.subr.bf16.mxu1 %v4166_v40  ;;  %v4254_v39 = vld [vmem:[#allocation8 + $0x50] ss:$8 sps:$4 sm:$0xff]   ;;  %v4257_v40 = vld [vmem:[#allocation8 + $0x60] ss:$8 sps:$4 sm:$0xff]  }
 0x170   : > { %2150 = vmatpush1.bf16.msra.mxu0 %v4161_v41  ;;  %2322 = vmatpush1.bf16.msra.mxu1 %v4164_v42  ;;  %v4262_v41 = vld [vmem:[#allocation8 + $0x74] ss:$8 sps:$4 sm:$0xff]   ;;  %v4260_v42 = vld [vmem:[#allocation8 + $0x70] ss:$8 sps:$4 sm:$0xff]  }
 0x171   : > { %2151 = vmatprep.subr.bf16.mxu0 %v4169_v30  ;;  %2323 = vmatprep.subr.bf16.mxu1 %v4172_v43  ;;  %v4265_v30 = vld [vmem:[#allocation8 + $0x84] ss:$8 sps:$4 sm:$0xff]   ;;  %v4263_v43 = vld [vmem:[#allocation8 + $0x80] ss:$8 sps:$4 sm:$0xff]  }
 0x174   : > { %2152 = vmatpush1.bf16.msra.mxu0 %v4167_v44  ;;  %2324 = vmatpush1.bf16.msra.mxu1 %v4170_v45  ;;  %v4268_v44 = vld [vmem:[#allocation8 + $0x94] ss:$8 sps:$4 sm:$0xff]   ;;  %v4266_v45 = vld [vmem:[#allocation8 + $0x90] ss:$8 sps:$4 sm:$0xff]  }
 0x175   : > { %2153 = vmatprep.subr.bf16.mxu0 %v4175_v46  ;;  %2325 = vmatprep.subr.bf16.mxu1 %v4178_v47  ;;  %v4271_v46 = vld [vmem:[#allocation8 + $0xa4] ss:$8 sps:$4 sm:$0xff]   ;;  %v4269_v47 = vld [vmem:[#allocation8 + $0xa0] ss:$8 sps:$4 sm:$0xff]  }
 0x178   : > { %2154 = vmatpush1.bf16.msra.mxu0 %v4173_v48  ;;  %2326 = vmatpush1.bf16.msra.mxu1 %v4176_v49  ;;  %v4274_v48 = vld [vmem:[#allocation8 + $0xb4] ss:$8 sps:$4 sm:$0xff]   ;;  %v4272_v49 = vld [vmem:[#allocation8 + $0xb0] ss:$8 sps:$4 sm:$0xff]  }
 0x179   : > { %2155 = vmatprep.subr.bf16.mxu0 %v4181_v50  ;;  %2327 = vmatprep.subr.bf16.mxu1 %v4184_v51  ;;  %v4277_v50 = vld [vmem:[#allocation8 + $0xc4] ss:$8 sps:$4 sm:$0xff]   ;;  %v4275_v51 = vld [vmem:[#allocation8 + $0xc0] ss:$8 sps:$4 sm:$0xff]  }
 0x17c   : > { %2156 = vmatpush1.bf16.msra.mxu0 %v4179_v52  ;;  %2328 = vmatpush1.bf16.msra.mxu1 %v4182_v53  ;;  %v4280_v52 = vld [vmem:[#allocation8 + $0xd4] ss:$8 sps:$4 sm:$0xff]   ;;  %v4278_v53 = vld [vmem:[#allocation8 + $0xd0] ss:$8 sps:$4 sm:$0xff]  }
 0x17d   : > { %2157 = vmatprep.subr.bf16.mxu0 %v4187_v54  ;;  %2329 = vmatprep.subr.bf16.mxu1 %v4190_v55  ;;  %v4283_v54 = vld [vmem:[#allocation8 + $0xe4] ss:$8 sps:$4 sm:$0xff]   ;;  %v4281_v55 = vld [vmem:[#allocation8 + $0xe0] ss:$8 sps:$4 sm:$0xff]  }
 0x180   : > { %2158 = vmatpush1.bf16.msra.mxu0 %v4185_v56  ;;  %2330 = vmatpush1.bf16.msra.mxu1 %v4188_v57  ;;  %v4286_v56 = vld [vmem:[#allocation8 + $0xf4] ss:$8 sps:$4 sm:$0xff]   ;;  %v4284_v57 = vld [vmem:[#allocation8 + $0xf0] ss:$8 sps:$4 sm:$0xff]  }
 0x181   : > { %2159 = vmatprep.subr.bf16.mxu0 %v4193_v58  ;;  %2331 = vmatprep.subr.bf16.mxu1 %v4196_v59  ;;  %v4289_v58 = vld [vmem:[#allocation8 + $0x104] ss:$8 sps:$4 sm:$0xff]  }
 0x182   : > { %v4335_v59 = vld [vmem:[#allocation9 + $0x40] sm:$0xff]  }
 0x184   : > { %2160 = vmatpush1.bf16.msra.mxu0 %v4191_v60  ;;  %2332 = vmatpush1.bf16.msra.mxu1 %v4194_v61  ;;  %v4336_v60 = vld [vmem:[#allocation9] sm:$0xff]   ;;  %v4337_v61 = vld [vmem:[#allocation9 + $0x48] sm:$0xff]  }
 0x185   : > { %2161 = vmatprep.subr.bf16.mxu0 %v4199_v62  ;;  %2333 = vmatprep.subr.bf16.mxu1 %v4202_v63  ;;  %v4338_v62 = vld [vmem:[#allocation9 + $0x8] sm:$0xff]   ;;  %v4339_v63 = vld [vmem:[#allocation9 + $0x50] sm:$0xff]  }
 0x188   : > { %2162 = vmatpush1.bf16.msra.mxu0 %v4197_v0  ;;  %2334 = vmatpush1.bf16.msra.mxu1 %v4200_v1  ;;  %v4340_v0 = vld [vmem:[#allocation9 + $0x10] sm:$0xff]   ;;  %v4341_v1 = vld [vmem:[#allocation9 + $0x58] sm:$0xff]  }
 0x189   : > { %2163 = vmatprep.subr.bf16.mxu0 %v4205_v2  ;;  %2335 = vmatprep.subr.bf16.mxu1 %v4208_v3  ;;  %v4342_v2 = vld [vmem:[#allocation9 + $0x18] sm:$0xff]   ;;  %v4343_v3 = vld [vmem:[#allocation9 + $0x60] sm:$0xff]  }
 0x18c   : > { %2164 = vmatpush1.bf16.msra.mxu0 %v4203_v4  ;;  %2336 = vmatpush1.bf16.msra.mxu1 %v4206_v5  ;;  %v4344_v4 = vld [vmem:[#allocation9 + $0x20] sm:$0xff]   ;;  %v4345_v5 = vld [vmem:[#allocation9 + $0x68] sm:$0xff]  }
 0x18d   : > { %2165 = vmatprep.subr.bf16.mxu0 %v4211_v6  ;;  %2337 = vmatprep.subr.bf16.mxu1 %v4214_v7  ;;  %v714_v6 = vlaneseq }
 0x18f   : > { %v4906_v7 = vshrl.u32 %v714_v6, 7  ;;  %v4328_v6 = vld [vmem:[#allocation8 + $0x1d4] ss:$8 sps:$4 sm:$0xff]  }
 0x190   : > { %2166 = vmatpush1.bf16.msra.mxu0 %v4209_v8  ;;  %2338 = vmatpush1.bf16.msra.mxu1 %v4212_v9 }
 0x191   : > { %2167 = vmatprep.subr.bf16.mxu0 %v4217_v10  ;;  %2339 = vmatprep.subr.bf16.mxu1 %v4220_v11  ;;  %v716_v8 = vsub.s32 0, %v4906_v7  ;;  %v724_v9 = vsub.s32 2, %v4906_v7  ;;  %v712_v10 = vld [vmem:[%s4988_s2] sm:$0xf]  ;;  %v720_v11 = vsub.s32 1, %v4906_v7 }
 0x194   : > { %2168 = vmatpush1.bf16.msra.mxu0 %v4215_v12  ;;  %2340 = vmatpush1.bf16.msra.mxu1 %v4218_v14  ;;  %v728_v12 = vsub.s32 3, %v4906_v7  ;;  %v717_v14 = vrot.slane %v712_v10, %v716_v8  ;;  %v4352_v7 = vld [vmem:[#allocation11 + $0x8] sm:$0xff]  }
 0x195   : > { %2169 = vmatprep.subr.bf16.mxu0 %v4223_v15  ;;  %2341 = vmatprep.subr.bf16.mxu1 %v4226_v16  ;;  %v725_v15 = vrot.slane %v712_v10, %v724_v9  ;;  %v721_v16 = vrot.slane %v712_v10, %v720_v11  ;;  %v4326_v9 = vld [vmem:[#allocation8 + $0x1d0] ss:$8 sps:$4 sm:$0xff]  }
 0x198   : > { %2170 = vmatpush1.bf16.msra.mxu0 %v4221_v17  ;;  %2342 = vmatpush1.bf16.msra.mxu1 %v4224_v18  ;;  %v729_v17 = vrot.slane %v712_v10, %v728_v12  ;;  %v4331_v10 = vld [vmem:[#allocation8 + $0x1e4] ss:$8 sps:$4 sm:$0xff]   ;;  %v4329_v12 = vld [vmem:[#allocation8 + $0x1e0] ss:$8 sps:$4 sm:$0xff]  }
 0x199   : > { %2171 = vmatprep.subr.bf16.mxu0 %v4229_v19  ;;  %2343 = vmatprep.subr.bf16.mxu1 %v4232_v20 }
 0x19c   : > { %2172 = vmatpush1.bf16.msra.mxu0 %v4227_v21  ;;  %2344 = vmatpush1.bf16.msra.mxu1 %v4230_v22 }
 0x19d   : > { %2173 = vmatprep.subr.bf16.mxu0 %v4235_v23  ;;  %2345 = vmatprep.subr.bf16.mxu1 %v4238_v24 }
 0x1a0   : > { %2174 = vmatpush1.bf16.msra.mxu0 %v4233_v25  ;;  %2346 = vmatpush1.bf16.msra.mxu1 %v4236_v26 }
 0x1a1   : > { %2766 = vmatprep.subr.bf16.mxu0 %v4241_v27  ;;  %3665 = vmatprep.subr.bf16.mxu1 %v4335_v59  ;;  %v4308_v59 = vld [vmem:[#allocation8 + $0x170] ss:$8 sps:$4 sm:$0xff]  }
 0x1a3   : > { %2176 = vmatmul.mubr.bf16.vlgmr.msra.gmra.mrb[0].mxu0 %v4900_v13  ;;  %2348 = vmatmul.mubr.bf16.vlgmr.msra.gmra.mrb[0].mxu1 %v4900_v13  ;;  %v4259_v13 = vld [vmem:[#allocation8 + $0x64] ss:$8 sps:$4 sm:$0xff]  }
 0x1a4   : > { %2767 = vmatpush1.bf16.msra.mxu0 %v4239_v28  ;;  %3666 = vmatpush3.bf16.msra.mxu1 %v4336_v60  ;;  %v4313_v60 = vld [vmem:[#allocation8 + $0x184] ss:$8 sps:$4 sm:$0xff]  }
 0x1a5   : > { %2768 = vmatprep.subr.bf16.mxu0 %v4244_v29  ;;  %3667 = vmatprep.subr.bf16.mxu1 %v4337_v61  ;;  %v4311_v61 = vld [vmem:[#allocation8 + $0x180] ss:$8 sps:$4 sm:$0xff]  }
 0x1a8   : > { %2769 = vmatpush1.bf16.msra.mxu0 %v4242_v31  ;;  %3668 = vmatpush3.bf16.msra.mxu1 %v4338_v62  ;;  %v4316_v62 = vld [vmem:[#allocation8 + $0x194] ss:$8 sps:$4 sm:$0xff]  }
 0x1a9   : > { %2770 = vmatprep.subr.bf16.mxu0 %v4247_v32  ;;  %3669 = vmatprep.subr.bf16.mxu1 %v4339_v63  ;;  %v4314_v63 = vld [vmem:[#allocation8 + $0x190] ss:$8 sps:$4 sm:$0xff]  }
 0x1ac   : > { %2771 = vmatpush1.bf16.msra.mxu0 %v4245_v33  ;;  %3670 = vmatpush3.bf16.msra.mxu1 %v4340_v0  ;;  %v4319_v0 = vld [vmem:[#allocation8 + $0x1a4] ss:$8 sps:$4 sm:$0xff]  }
 0x1ad   : > { %2772 = vmatprep.subr.bf16.mxu0 %v4250_v34  ;;  %3671 = vmatprep.subr.bf16.mxu1 %v4341_v1  ;;  %v4317_v1 = vld [vmem:[#allocation8 + $0x1a0] ss:$8 sps:$4 sm:$0xff]  }
 0x1b0   : > { %2773 = vmatpush1.bf16.msra.mxu0 %v4248_v35  ;;  %3672 = vmatpush3.bf16.msra.mxu1 %v4342_v2  ;;  %v4322_v2 = vld [vmem:[#allocation8 + $0x1b4] ss:$8 sps:$4 sm:$0xff]  }
 0x1b1   : > { %2774 = vmatprep.subr.bf16.mxu0 %v4253_v36  ;;  %3673 = vmatprep.subr.bf16.mxu1 %v4343_v3  ;;  %v4320_v3 = vld [vmem:[#allocation8 + $0x1b0] ss:$8 sps:$4 sm:$0xff]  }
 0x1b4   : > { %2775 = vmatpush1.bf16.msra.mxu0 %v4251_v37  ;;  %3674 = vmatpush3.bf16.msra.mxu1 %v4344_v4  ;;  %v4325_v4 = vld [vmem:[#allocation8 + $0x1c4] ss:$8 sps:$4 sm:$0xff]  }
 0x1b5   : > { %2776 = vmatprep.subr.bf16.mxu0 %v4256_v38  ;;  %3675 = vmatprep.subr.bf16.mxu1 %v4345_v5  ;;  %v4323_v5 = vld [vmem:[#allocation8 + $0x1c0] ss:$8 sps:$4 sm:$0xff]  }
 0x1b8   : > { %2777 = vmatpush1.bf16.msra.mxu0 %v4254_v39 }
 0x1b9   : > { %2778 = vmatprep.subr.bf16.mxu0 %v4259_v13 }
 0x1bc   : > { %2779 = vmatpush1.bf16.msra.mxu0 %v4257_v40 }
 0x1bd   : > { %2780 = vmatprep.subr.bf16.mxu0 %v4262_v41 }
 0x1c0   : > { %2781 = vmatpush1.bf16.msra.mxu0 %v4260_v42 }
 0x1c1   : > { %2782 = vmatprep.subr.bf16.mxu0 %v4265_v30 }
 0x1c4   : > { %2783 = vmatpush1.bf16.msra.mxu0 %v4263_v43 }
 0x1c5   : > { %2784 = vmatprep.subr.bf16.mxu0 %v4268_v44 }
 0x1c8   : > { %2785 = vmatpush1.bf16.msra.mxu0 %v4266_v45  ;;  %v4287_v45 = vld [vmem:[#allocation8 + $0x100] ss:$8 sps:$4 sm:$0xff]  }
 0x1c9   : > { %2786 = vmatprep.subr.bf16.mxu0 %v4271_v46  ;;  %v4292_v46 = vld [vmem:[#allocation8 + $0x114] ss:$8 sps:$4 sm:$0xff]  }
 0x1cc   : > { %2787 = vmatpush1.bf16.msra.mxu0 %v4269_v47  ;;  %v4290_v47 = vld [vmem:[#allocation8 + $0x110] ss:$8 sps:$4 sm:$0xff]  }
 0x1cd   : > { %2788 = vmatprep.subr.bf16.mxu0 %v4274_v48  ;;  %v4295_v48 = vld [vmem:[#allocation8 + $0x124] ss:$8 sps:$4 sm:$0xff]  }
 0x1d0   : > { %2789 = vmatpush1.bf16.msra.mxu0 %v4272_v49  ;;  %v4293_v49 = vld [vmem:[#allocation8 + $0x120] ss:$8 sps:$4 sm:$0xff]  }
 0x1d1   : > { %2790 = vmatprep.subr.bf16.mxu0 %v4277_v50  ;;  %v4298_v50 = vld [vmem:[#allocation8 + $0x134] ss:$8 sps:$4 sm:$0xff]  }
 0x1d4   : > { %2791 = vmatpush1.bf16.msra.mxu0 %v4275_v51  ;;  %v4296_v51 = vld [vmem:[#allocation8 + $0x130] ss:$8 sps:$4 sm:$0xff]  }
 0x1d5   : > { %2792 = vmatprep.subr.bf16.mxu0 %v4280_v52  ;;  %v4301_v52 = vld [vmem:[#allocation8 + $0x144] ss:$8 sps:$4 sm:$0xff]  }
 0x1d8   : > { %2793 = vmatpush1.bf16.msra.mxu0 %v4278_v53  ;;  %v4299_v53 = vld [vmem:[#allocation8 + $0x140] ss:$8 sps:$4 sm:$0xff]  }
 0x1d9   : > { %2794 = vmatprep.subr.bf16.mxu0 %v4283_v54  ;;  %v4304_v54 = vld [vmem:[#allocation8 + $0x154] ss:$8 sps:$4 sm:$0xff]  }
 0x1dc   : > { %2795 = vmatpush1.bf16.msra.mxu0 %v4281_v55  ;;  %v4302_v55 = vld [vmem:[#allocation8 + $0x150] ss:$8 sps:$4 sm:$0xff]  }
 0x1dd   : > { %2796 = vmatprep.subr.bf16.mxu0 %v4286_v56  ;;  %v4307_v56 = vld [vmem:[#allocation8 + $0x164] ss:$8 sps:$4 sm:$0xff]  }
 0x1e0   : > { %2797 = vmatpush1.bf16.msra.mxu0 %v4284_v57  ;;  %v4305_v57 = vld [vmem:[#allocation8 + $0x160] ss:$8 sps:$4 sm:$0xff]  }
 0x1e1   : > { %2809 = vmatprep.subr.bf16.mxu0 %v4289_v58  ;;  %v4310_v58 = vld [vmem:[#allocation8 + $0x174] ss:$8 sps:$4 sm:$0xff]  }
 0x276   : > { %v2177_v18 = vpop.f32.mrb[0].mxu0  ;;  %v2349_v19 = vpop.f32.mrb[0].mxu1 }
 0x277   : > { %v3716_v20 = vadd.f32 %v2177_v18, %v717_v14  ;;  %v3720_v21 = vadd.f32 %v2349_v19, %v725_v15  ;;  %v2179_v22 = vpop.f32.mrb[1].mxu0  ;;  %v2351_v23 = vpop.f32.mrb[1].mxu1  ;;  %v4348_v18 = vld [vmem:[#allocation9 + $0x30] sm:$0xff]   ;;  %v4349_v19 = vld [vmem:[#allocation9 + $0x78] sm:$0xff]  }
 0x278   : > { %v3717_v24 = vadd.f32 %v2179_v22, %v721_v16  ;;  %v3721_v25 = vadd.f32 %v2351_v23, %v729_v17  ;;  %v2181_v26 = vpop.f32.mrb[2].mxu0  ;;  %v2353_v27 = vpop.f32.mrb[2].mxu1  ;;  %v2434_v22 = vld [vmem:[%s4990_s4] sm:$0x3] }
 0x279   : > { %v3718_v28 = vadd.f32 %v2181_v26, %v717_v14  ;;  %v3722_v29 = vadd.f32 %v2353_v27, %v725_v15  ;;  %v2183_v31 = vpop.f32.mrb[3].mxu0  ;;  %v2355_v32 = vpop.f32.mrb[3].mxu1  ;;  %v2358_v35 = vmax.f32 %v3716_v20, 0.0  ;;  %v2360_v36 = vmax.f32 %v3720_v21, 0.0  ;;  %v4334_v14 = vld [vmem:[#allocation8 + $0x1f4] ss:$8 sps:$4 sm:$0xff]  }
 0x27a   : > { %v3719_v33 = vadd.f32 %v2183_v31, %v721_v16  ;;  %v3723_v34 = vadd.f32 %v2355_v32, %v729_v17  ;;  %v2359_v39 = vmax.f32 %v3717_v24, 0.0  ;;  %v2361_v13 = vmax.f32 %v3721_v25, 0.0  ;;  %v4332_v15 = vld [vmem:[#allocation8 + $0x1f0] ss:$8 sps:$4 sm:$0xff]   ;;  %v4346_v16 = vld [vmem:[#allocation9 + $0x28] sm:$0xff]  }
 0x27b   : > { %v2362_v37 = vmax.f32 %v3718_v28, 0.0  ;;  %v2364_v38 = vmax.f32 %v3722_v29, 0.0  ;;  %3676 = vmatpush3.bf16.msra.mxu1 %v4346_v16  ;;  %v4347_v17 = vld [vmem:[#allocation9 + $0x70] sm:$0xff]   ;;  %v4350_v20 = vld [vmem:[#allocation9 + $0x38] sm:$0xff]   ;;  %v4590_v21 = vmov 0.0   ;;  %v2439_v23 = vrot.slane %v2434_v22, %v716_v8 }
 0x27c   : > { %v2363_v40 = vmax.f32 %v3719_v33, 0.0  ;;  %v2365_v41 = vmax.f32 %v3723_v34, 0.0  ;;  %3677 = vmatprep.subr.bf16.mxu1 %v4347_v17  ;;  %v2443_v24 = vrot.slane %v2434_v22, %v720_v11  ;;  %v4353_v8 = vld [vmem:[#allocation11 + $0x10] sm:$0xff]   ;;  %v4354_v11 = vld [vmem:[#allocation11 + $0x18] sm:$0xff]  }
 0x27d   : > { %v2366_v42 = vpack.c.bf16 %v2362_v37, %v2358_v35  ;;  %v4919_v30 = vpack.c.bf16 %v2364_v38, %v2360_v36 }
 0x27e   : > { %v2367_v43 = vpack.c.bf16 %v2363_v40, %v2359_v39  ;;  %v2369_v44 = vpack.c.bf16 %v2365_v41, %v2361_v13  ;;  %v4351_v13 = vld [vmem:[#allocation11] sm:$0xff]   ;;  %v4356_v41 = vld [vmem:[#allocation11 + $0x28] sm:$0xff]  }
 0x27f   : > { %3678 = vmatpush3.bf16.msra.mxu1 %v4348_v18  ;;  %v4355_v40 = vld [vmem:[#allocation11 + $0x20] sm:$0xff]  }
 0x280   : > { %2798 = vmatprep.mubr.bf16.mxu0 %v2367_v43  ;;  %3679 = vmatprep.subr.bf16.mxu1 %v4349_v19 }
 0x281   : > { %2799 = vmatmul.mubr.bf16.vlgmr.msra.gmra.mrb[4].mxu0 %v2366_v42  ;;  %v4357_v42 = vld [vmem:[#allocation11 + $0x30] sm:$0xff]  }
 0x282   : > { %2810 = vmatpush1.bf16.msra.mxu0 %v4287_v45  ;;  %2841 = vmatprep.mubr.bf16.mxu0 %v2369_v44  ;;  %v3622_v44 = vld [vmem:[%s4992_s6] ss:$0 sm:$0xff] }
 0x283   : > { %2811 = vmatprep.subr.bf16.mxu0 %v4292_v46  ;;  %3680 = vmatpush3.bf16.msra.mxu1 %v4350_v20 }
 0x284   : > { %3696 = vmatprep.subr.bf16.mxu1 %v4590_v21 }
 0x286   : > { %2812 = vmatpush1.bf16.msra.mxu0 %v4290_v47 }
 0x287   : > { %2813 = vmatprep.subr.bf16.mxu0 %v4295_v48 }
 0x28a   : > { %2814 = vmatpush1.bf16.msra.mxu0 %v4293_v49 }
 0x28b   : > { %2815 = vmatprep.subr.bf16.mxu0 %v4298_v50 }
 0x28e   : > { %2816 = vmatpush1.bf16.msra.mxu0 %v4296_v51 }
 0x28f   : > { %2817 = vmatprep.subr.bf16.mxu0 %v4301_v52 }
 0x292   : > { %2818 = vmatpush1.bf16.msra.mxu0 %v4299_v53 }
 0x293   : > { %2819 = vmatprep.subr.bf16.mxu0 %v4304_v54 }
 0x296   : > { %2820 = vmatpush1.bf16.msra.mxu0 %v4302_v55  ;;  %v3639_v55 = vld [vmem:[%s4994_s8] ss:$0 sm:$0xff] }
 0x297   : > { %2821 = vmatprep.subr.bf16.mxu0 %v4307_v56 }
 0x29a   : > { %2822 = vmatpush1.bf16.msra.mxu0 %v4305_v57 }
 0x29b   : > { %2823 = vmatprep.subr.bf16.mxu0 %v4310_v58 }
 0x29e   : > { %2824 = vmatpush1.bf16.msra.mxu0 %v4308_v59 }
 0x29f   : > { %2825 = vmatprep.subr.bf16.mxu0 %v4313_v60 }
 0x2a2   : > { %2826 = vmatpush1.bf16.msra.mxu0 %v4311_v61 }
 0x2a3   : > { %2827 = vmatprep.subr.bf16.mxu0 %v4316_v62 }
 0x2a6   : > { %2828 = vmatpush1.bf16.msra.mxu0 %v4314_v63 }
 0x2a7   : > { %2829 = vmatprep.subr.bf16.mxu0 %v4319_v0 }
 0x2aa   : > { %2830 = vmatpush1.bf16.msra.mxu0 %v4317_v1 }
 0x2ab   : > { %2831 = vmatprep.subr.bf16.mxu0 %v4322_v2 }
 0x2ae   : > { %2832 = vmatpush1.bf16.msra.mxu0 %v4320_v3 }
 0x2af   : > { %2833 = vmatprep.subr.bf16.mxu0 %v4325_v4 }
 0x2b2   : > { %2834 = vmatpush1.bf16.msra.mxu0 %v4323_v5 }
 0x2b3   : > { %2835 = vmatprep.subr.bf16.mxu0 %v4328_v6 }
 0x2b6   : > { %2836 = vmatpush1.bf16.msra.mxu0 %v4326_v9 }
 0x2b7   : > { %2837 = vmatprep.subr.bf16.mxu0 %v4331_v10 }
 0x2ba   : > { %2838 = vmatpush1.bf16.msra.mxu0 %v4329_v12 }
 0x2bb   : > { %2839 = vmatprep.subr.bf16.mxu0 %v4334_v14 }
 0x2be   : > { %2840 = vmatpush1.bf16.msra.mxu0 %v4332_v15 }
 0x2c1   : > { %2842 = vmatmul.mubr.bf16.vlgmr.msra.gmra.mrb[4].mxu0 %v4919_v30  ;;  %v4358_v30 = vld [vmem:[#allocation11 + $0x38] sm:$0xff]  }
 0x394   : > { %v2843_v25 = vpop.f32.mrb[4].mxu0 }
 0x395   : > { %v3724_v26 = vadd.f32 %v2843_v25, %v2439_v23  ;;  %v2845_v27 = vpop.f32.mrb[5].mxu0 }
 0x396   : > { %v3725_v28 = vadd.f32 %v2845_v27, %v2443_v24  ;;  %v2847_v29 = vpop.f32.mrb[6].mxu0 }
 0x397   : > { %v3726_v31 = vadd.f32 %v2847_v29, %v2439_v23  ;;  %v2849_v32 = vpop.f32.mrb[7].mxu0  ;;  %v2852_v34 = vmax.f32 %v3724_v26, 0.0 }
 0x398   : > { %v3727_v33 = vadd.f32 %v2849_v32, %v2443_v24  ;;  %v2853_v36 = vmax.f32 %v3725_v28, 0.0 }
 0x399   : > { %v2854_v35 = vmax.f32 %v3726_v31, 0.0 }
 0x39a   : > { %v2855_v37 = vmax.f32 %v3727_v33, 0.0 }
 0x39b   : > { %v2856_v38 = vpack.c.bf16 %v2854_v35, %v2852_v34 }
 0x39c   : > { %v2857_v39 = vpack.c.bf16 %v2855_v37, %v2853_v36 }
 0x39e   : > { %3025 = vmatprep.mubr.bf16.mxu1 %v2857_v39 }
 0x39f   : > { %3026 = vmatmul.mubr.bf16.vlgmr.msra.gmra.mrb[4].mxu1 %v2856_v38 }
 0x3a0   : > { %3697 = vmatpush3.bf16.msra.mxu1 %v4351_v13  ;;  %3712 = vmatprep.mubr.msk.bf16.mxu1 %vm4591_vm2, %v4590_v21 }
 0x3a1   : > { %3698 = vmatprep.subr.bf16.mxu1 %v4590_v21 }
 0x3a4   : > { %3699 = vmatpush3.bf16.msra.mxu1 %v4352_v7 }
 0x3a5   : > { %3700 = vmatprep.subr.bf16.mxu1 %v4590_v21 }
 0x3a8   : > { %3701 = vmatpush3.bf16.msra.mxu1 %v4353_v8 }
 0x3a9   : > { %3702 = vmatprep.subr.bf16.mxu1 %v4590_v21 }
 0x3ac   : > { %3703 = vmatpush3.bf16.msra.mxu1 %v4354_v11 }
 0x3ad   : > { %3704 = vmatprep.subr.bf16.mxu1 %v4590_v21 }
 0x3b0   : > { %3705 = vmatpush3.bf16.msra.mxu1 %v4355_v40 }
 0x3b1   : > { %3706 = vmatprep.subr.bf16.mxu1 %v4590_v21 }
 0x3b4   : > { %3707 = vmatpush3.bf16.msra.mxu1 %v4356_v41 }
 0x3b5   : > { %3708 = vmatprep.subr.bf16.mxu1 %v4590_v21 }
 0x3b8   : > { %3709 = vmatpush3.bf16.msra.mxu1 %v4357_v42 }
 0x3b9   : > { %3710 = vmatprep.subr.bf16.mxu1 %v4590_v21 }
 0x3bc   : > { %3711 = vmatpush3.bf16.msra.mxu1 %v4358_v30 }
 0x472   : > { %v3681_v43 = vpop.f32.mrb[4].mxu1 }
 0x473   : > { %v3682_v45 = vpop.f32.mrb[5].mxu1 }
 0x474   : > { %v3683_v46 = vadd.f32 %v3682_v45, %v3681_v43  ;;  %v3684_v47 = vpop.f32.mrb[6].mxu1 }
 0x475   : > { %v3685_v48 = vpop.f32.mrb[7].mxu1 }
 0x476   : > { %v3028_v49 = vadd.f32 %v3683_v46, %v3622_v44  ;;  %v3686_v50 = vadd.f32 %v3685_v48, %v3684_v47 }
 0x478   : > { %v3031_v51 = vadd.f32 %v3686_v50, %v3622_v44  ;;  %v3034_v52 = vmax.f32 %v3028_v49, 0.0 }
 0x47a   : > { %v3035_v53 = vmax.f32 %v3031_v51, 0.0 }
 0x47c   : > { %v3036_v54 = vpack.c.bf16 %v3035_v53, %v3034_v52 }
 0x47e   : > { %3713 = vmatmul.mubr.bf16.vlgmr.msra.gmra.mrb[8].mxu1 %v3036_v54 }
 0x551   : > { %v3142_v56 = vpop.f32.mrb[8].mxu1 }
 0x552   : > { %v3714_v57 = vpop.f32.mrb[9].mxu1  ;;  %v3143_v59 = vadd.f32 %v3639_v55, %v3142_v56 }
 0x553   : > { %v3145_v58 = vpop.f32.mrb[10].mxu1 }
 0x554   : > { %v3146_v60 = vadd.f32 %v3639_v55, %v3145_v58  ;;  %v3715_v61 = vpop.f32.mrb[11].mxu1 }
 0x556   : > { %v3663_v62 = vpack.c.bf16 %v3146_v60, %v3143_v59 }
 0x558   : > { %3664 = vst [vmem:[%s409_s14] sm:$0xff] %v3663_v62  }
 0x559   : > { %4514 = shalt.err (!%p4511_p13)
}
 0x55a   : > { %s4515_s16 = scalar_lea.hbm %s4942_s15, 128  ;;  %s4519_s1 = scalar_lea.hbm %s4995_s9, 256 }
 0x55b   : > { %p4516_p9 = scmp.ne.s32.totalorder %s4942_s15, %s4515_s16  ;;  %p4520_p4 = scmp.lt.u32.totalorder %s4942_s15, %s4995_s9 }
 0x55c   : > { %p4521_p8 = scmp.lt.u32.totalorder %s4519_s1, %s4515_s16  ;;  %p4523_p3 = scmp.lt.u32.totalorder %s4515_s16, %s4942_s15 }
 0x55d   : > { %p4517_p0 = pnand %p4516_p9, %p4807_p10 }
 0x55e   : > { %p4522_p6 = por %p4521_p8, %p4520_p4 }
 0x55f   : > { %p4518_p11 = pneg %p4517_p0 }
 0x560   : > { %p4524_p5 = por %p4523_p3, %p4522_p6 }
 0x562   : > { %p4525_p7 = pnand %p4524_p5, %p4518_p11 }
 0x564   : > { %4528 = shalt.err (!%p4525_p7)
}
 0x565   : > { %s4593_s19 = smov 64   ;;  %s4594_s29 = smov 4  }
 0x566   : > { %3774 = dma.vmem_to_hbm [thread:$0]  (%p4807_p10), %s4937_s20, 128, %s4942_s15, %s3160_s17, %s4593_s19, %s4593_s19, %s4594_s29  }
 0x567 PF: > { %s5024_s23 = sld [smem:[#allocation17_spill]]  ;;  %s5025_s13 = sld [smem:[#allocation18_spill]] }
 0x568   : > { %p5027_p2 = scmp.ge.s32.totalorder %s4575_s12, 2 }
 0x56d   : > { %s3188_s22 = sand.u32 1, %s5024_s23   ;;  %p5026_p12 = scmp.ne.s32.totalorder %s5025_s13, 0 }
 0x56e   : > { %s3189_s21 = scalar_lea.sflag [#allocation5], %s3188_s22 }
 0x56f   : > { %p3794_p1 = pnand %p5027_p2, %p5026_p12 }
 0x571   : > { %4558 = dma.done.wait (!%p3794_p1), %s3189_s21, 128  }
 0x572   : > { %4560 = vsyncadd (!%p3794_p1), %s3189_s21, 4294967168  ;;  %p24_p13 = scmp.ge.s32.totalorder %s4797_s28, 4   ;;  %s5028_s30 = smov %s4567_s10 }
 0x573   : > { %s5029_s10 = smov %s4571_s11  ;;  %s5030_s11 = smov %s4813_s26 }
 0x574   : > { %s5031_s12 = smov %s4797_s28  ;;  %26 = sbr.rel (!%p24_p13) target bundleno = 9 (0x9), region = 117 }
 0x57b   :  { %3194 = vsyncpa [#allocation4], 1 }
 0x57c   :  { %3196 = vsyncpa [#allocation4 + $0x1], 1 }
 0x57d   :  { %3197 = vsyncpa [#allocation7], 1 }
 0x57e   :  { %3198 = vsyncpa [#allocation10], 1 }
 0x57f   :  { %3199 = vsyncpa [#allocation5], 1 }
 0x580   :  { %3201 = vsyncpa [#allocation5 + $0x1], 1 }

</bundles_post_ra>
